<compile_context>
chip_gen: v7x
topology: tpu7x:2x2x1
jax: 0.10.0
libtpu: 0.0.40
codegen_flags: <defaults>
</compile_context>

<pallas_src>
import functools

import jax
import jax.numpy as jnp
import numpy as np
from jax import lax
from jax.experimental import pallas as pl
from jax.experimental.pallas import tpu as pltpu

_INV_SQRT2 = 0.7071067811865476
_GN_EPS = 1e-8      # nn.GroupNorm(1, dim, eps=1e-08)
_NORM_EPS = 1e-6


def _erf_poly(x):
    """Abramowitz & Stegun 7.1.26 erf approximation (|abs err| <= ~1.5e-7).

    exp goes to the EUP, the rest is a short VPU polynomial; the division is an
    approximate EUP reciprocal (adds ~1e-4 rel error, far below the bf16 matmul
    noise the kernel already accepts)."""
    p = 0.3275911
    a1, a2, a3, a4, a5 = (0.254829592, -0.284496736, 1.421413741,
                          -1.453152027, 1.061405429)
    ax = jnp.abs(x)
    t = pl.reciprocal(1.0 + p * ax, approx=True)
    poly = ((((a5 * t + a4) * t + a3) * t + a2) * t + a1) * t
    e = 1.0 - poly * jnp.exp(-(ax * ax))
    return jnp.where(x < 0.0, -e, e)


def _gelu_exact(x):
    return 0.5 * x * (1.0 + _erf_poly(x * _INV_SQRT2))


def ctrn_fuse_kernel(x_ref, slab_c_ref, slab_h_ref, w_pw_ref, w_p_ref, o_ref,
                     *, mxu_dtype):
    x = x_ref[...].astype(jnp.float32)            # (bb, C, T)
    sc = slab_c_ref[...]                          # (C, 6)
    sh = slab_h_ref[...]                          # (H, 8)
    bb, C, T = x.shape
    H = sh.shape[0]

    # --- unpack the packed parameter slabs (static slices, zero-cost views) --
    w_dw = sc[:, 0:3]                             # (C, 3) depthwise taps
    b_dw = sc[:, 3:4].reshape(1, C, 1)
    gn_w = sc[:, 4:5].reshape(1, C, 1)
    gn_b = sc[:, 5:6].reshape(1, C, 1)
    w_dwh = sh[:, 0:3]                            # (H, 3) depthwise_half taps
    b_dwh = sh[:, 3:4].reshape(1, H, 1)
    b_pw = sh[:, 4:5].reshape(1, H, 1)
    b_p = sh[:, 5:6].reshape(1, H, 1)
    gamma = sh[:, 6:7].reshape(1, H, 1)
    beta = sh[:, 7:8].reshape(1, H, 1)

    batch_dims = (((2,), (1,)), ((0,), (0,)))     # (bb,M,K) @ (bb,K,N)

    # (T, T) shift matrices: exact 'same'-padded k=3 depthwise conv as two
    # matmuls on the otherwise idle MXU (no lane rolls / edge masks needed).
    row = lax.broadcasted_iota(jnp.int32, (T, T), 0)
    col = lax.broadcasted_iota(jnp.int32, (T, T), 1)
    s_prev = jnp.where(col == row + 1, 1.0, 0.0).astype(jnp.float32)
    s_next = jnp.where(col + 1 == row, 1.0, 0.0).astype(jnp.float32)
    s_prev_b = jnp.broadcast_to(s_prev, (bb, T, T))
    s_next_b = jnp.broadcast_to(s_next, (bb, T, T))

    def dwconv_same(v, w3, b):
        """Depthwise Conv1d, k=3, padding='same' on a (bb, R, T) f32 tile."""
        v_prev = lax.dot_general(v, s_prev_b, batch_dims,
                                 preferred_element_type=jnp.float32)
        v_next = lax.dot_general(v, s_next_b, batch_dims,
                                 preferred_element_type=jnp.float32)
        w0 = w3[:, 0:1].reshape(1, -1, 1)
        w1 = w3[:, 1:2].reshape(1, -1, 1)
        w2 = w3[:, 2:3].reshape(1, -1, 1)
        return w0 * v_prev + w1 * v + w2 * v_next + b

    def sum_channels(v):
        """(bb, R, T) -> per-time-step channel sum (bb, 1, T), on the MXU."""
        ones = jnp.ones((bb, 1, v.shape[1]), jnp.float32)
        return lax.dot_general(ones, v, batch_dims,
                               preferred_element_type=jnp.float32)

    def pointwise(w_b, v, b):
        """1x1 conv: (bb, O, K) bf16 @ (bb, K, T) bf16 -> (bb, O, T) f32."""
        return lax.dot_general(w_b, v.astype(mxu_dtype), batch_dims,
                               preferred_element_type=jnp.float32) + b

    w_pw_b = jnp.broadcast_to(w_pw_ref[...], (bb, H, C))      # bf16
    w_p_b = jnp.broadcast_to(w_p_ref[...], (bb, H, H))        # bf16 (used twice)

    # --------- f(x) = GELU(pointwise(GroupNorm(depthwise(x)))) ---------------
    h = dwconv_same(x, w_dw, b_dw)                            # (bb, C, T)

    # GroupNorm(num_groups=1): per-sample stats over (C, T), two-pass.
    inv_n = 1.0 / float(C * T)
    mu = jnp.sum(sum_channels(h), axis=-1, keepdims=True) * inv_n      # (bb,1,1)
    hc = h - mu
    var = jnp.sum(sum_channels(hc * hc), axis=-1, keepdims=True) * inv_n
    hn = hc * lax.rsqrt(var + _GN_EPS) * gn_w + gn_b          # (bb, C, T)

    y = _gelu_exact(pointwise(w_pw_b, hn, b_pw))              # (bb, H, T)

    # --------- yt = p(y);  Nt = per-time-step channel norm -------------------
    yt = pointwise(w_p_b, y, b_p)                             # (bb, H, T)
    Gt = jnp.sqrt(sum_channels(yt * yt))                      # (bb, 1, T)
    # Module: Gt.mean(dim=-2) is a mean over a size-1 axis -> identity.
    Nt = Gt * pl.reciprocal(Gt + _NORM_EPS, approx=True)

    # --------- yc = depthwise_half(y);  Nc = per-sample time norm ------------
    yc = dwconv_same(y, w_dwh, b_dwh)                         # (bb, H, T)
    Gc = jnp.sqrt(jnp.sum(yc * yc, axis=-1, keepdims=True))   # (bb, H, 1)
    # Module: Gc.mean(dim=-1) is a mean over a size-1 axis -> identity.
    Nc = Gc * pl.reciprocal(Gc + _NORM_EPS, approx=True)

    # --------- fuse + final 1x1 conv ------------------------------------------
    z = gamma * (y * Nt * Nc) + beta + y                      # (bb, H, T)
    out = pointwise(w_p_b, z, b_p)                            # (bb, H, T)
    o_ref[...] = out.astype(o_ref.dtype)


def _tensorcores_per_chip():
    """Best-effort TensorCore-per-chip count (v7x / v4-style megacore -> 2)."""
    try:
        kind = jax.devices()[0].device_kind.lower()
    except Exception:
        return 1
    return 2 if ("v7" in kind or "tpu7" in kind or "v4" in kind) else 1


def _choose_block_batch(batch, per_sample_bytes, *, budget_bytes, num_cores):
    """Largest divisor of `batch` whose per-step footprint fits the VMEM budget.
    On multi-TensorCore chips prefer a grid-step count that is a multiple of
    the core count so every core gets equal work."""
    divisors = [d for d in range(1, batch + 1) if batch % d == 0]
    fitting = [d for d in divisors if d * per_sample_bytes <= budget_bytes] or [1]
    bb = max(fitting)
    if num_cores > 1:
        balanced = [d for d in fitting if (batch // d) % num_cores == 0]
        if balanced:
            bb = max(balanced)
    return bb


def ctrn_fuse(x, params, *, mxu_dtype=jnp.bfloat16, out_dtype=jnp.float32,
              vmem_budget_bytes=12 * 2**20):
    """CTRNFuse forward.  x: (B, C, T) -> (B, C//2, T).

    x is consumed in its natural (B, C, T) layout (no wrapper-side transpose /
    reshape HBM round-trips); the grid tiles the batch dimension only.  Pass
    out_dtype=jnp.bfloat16 to halve output HBM traffic if the consumer
    tolerates it (the kernel is HBM-bound at these channel widths)."""
    B, C, T = x.shape
    assert C % 2 == 0, "dim must be even"
    H = C // 2

    # Rough per-sample f32 footprint (live intermediates + broadcast shift
    # matrices); used only to size the per-grid-step batch slice.
    per_sample_bytes = (8 * C + 12 * H) * T * 4 + 8 * T * T
    bb = _choose_block_batch(B, per_sample_bytes,
                             budget_bytes=vmem_budget_bytes,
                             num_cores=_tensorcores_per_chip())

    # Pack the 12 tiny parameters into 2 slabs + 2 (pre-cast) weight matrices.
    slab_c = jnp.concatenate(
        [params["w_dw"], params["b_dw"], params["gn_w"], params["gn_b"]],
        axis=1).astype(jnp.float32)                                     # (C, 6)
    slab_h = jnp.concatenate(
        [params["w_dwh"], params["b_dwh"], params["b_pw"], params["b_p"],
         params["gamma"], params["beta"]], axis=1).astype(jnp.float32)  # (H, 8)
    w_pw = params["w_pw"].astype(mxu_dtype)                             # (H, C)
    w_p = params["w_p"].astype(mxu_dtype)                               # (H, H)

    kernel = functools.partial(ctrn_fuse_kernel, mxu_dtype=mxu_dtype)

    cost = pl.CostEstimate(
        flops=int(2 * B * T * (H * C + 2 * H * H)        # 1x1 convs
                  + 4 * B * T * T * (C + H)              # shift-matrix dwconvs
                  + 2 * B * T * (2 * C + H)),            # ones-vector reductions
        transcendentals=int(B * T * H),                  # exp inside GELU
        bytes_accessed=int(x.dtype.itemsize * B * C * T
                           + jnp.dtype(out_dtype).itemsize * B * H * T
                           + 4 * (slab_c.size + slab_h.size)
                           + jnp.dtype(mxu_dtype).itemsize
                           * (w_pw.size + w_p.size)),
    )

    return pl.pallas_call(
        kernel,
        out_shape=jax.ShapeDtypeStruct((B, H, T), out_dtype),
        grid=(B // bb,),
        in_specs=[
            pl.BlockSpec((bb, C, T), lambda i: (i, 0, 0)),
            pl.BlockSpec(slab_c.shape, lambda i: (0, 0)),
            pl.BlockSpec(slab_h.shape, lambda i: (0, 0)),
            pl.BlockSpec(w_pw.shape, lambda i: (0, 0)),
            pl.BlockSpec(w_p.shape, lambda i: (0, 0)),
        ],
        out_specs=pl.BlockSpec((bb, H, T), lambda i: (i, 0, 0)),
        compiler_params=pltpu.CompilerParams(
            dimension_semantics=("parallel",),
            vmem_limit_bytes=48 * 2**20),
        cost_estimate=cost,
    )(x, slab_c, slab_h, w_pw, w_p)


# ------------------------- pure-JAX reference -------------------------
def _dwconv_same_ref(v, w, b):
    v_prev = jnp.pad(v, ((0, 0), (0, 0), (1, 0)))[:, :, :-1]
    v_next = jnp.pad(v, ((0, 0), (0, 0), (0, 1)))[:, :, 1:]
    return (w[None, :, 0:1] * v_prev + w[None, :, 1:2] * v
            + w[None, :, 2:3] * v_next + b[None])


def ctrn_fuse_ref(x, p, mxu_dtype=jnp.float32):
    """Pure-JAX reference.  mxu_dtype=bfloat16 mirrors the kernel's mixed-
    precision matmul policy; float32 is the exact module semantics."""
    mm = lambda w, a: jnp.einsum("oc,bct->bot", w.astype(mxu_dtype),
                                 a.astype(mxu_dtype),
                                 preferred_element_type=jnp.float32)
    h = _dwconv_same_ref(x, p["w_dw"], p["b_dw"])
    mu = jnp.mean(h, axis=(1, 2), keepdims=True)
    var = jnp.mean((h - mu) ** 2, axis=(1, 2), keepdims=True)
    hn = (h - mu) / jnp.sqrt(var + _GN_EPS) * p["gn_w"][None] + p["gn_b"][None]
    y = jax.nn.gelu(mm(p["w_pw"], hn) + p["b_pw"][None], approximate=False)
    yt = mm(p["w_p"], y) + p["b_p"][None]
    Gt = jnp.sqrt(jnp.sum(yt * yt, axis=1, keepdims=True))
    Nt = Gt / (jnp.mean(Gt, axis=-2, keepdims=True) + _NORM_EPS)
    yc = _dwconv_same_ref(y, p["w_dwh"], p["b_dwh"])
    Gc = jnp.sqrt(jnp.sum(yc * yc, axis=2, keepdims=True))
    Nc = Gc / (jnp.mean(Gc, axis=-1, keepdims=True) + _NORM_EPS)
    z = p["gamma"][None] * (y * Nt * Nc) + p["beta"][None] + y
    return mm(p["w_p"], z) + p["b_p"][None]


def make_params(dim, key):
    H = dim // 2
    ks = jax.random.split(key, 12)
    u = lambda k, shape, s: jax.random.uniform(k, shape, jnp.float32, -s, s)
    return {
        "w_dw":  u(ks[0], (dim, 3), 1.0 / np.sqrt(3.0)),
        "b_dw":  u(ks[1], (dim, 1), 1.0 / np.sqrt(3.0)),
        "gn_w":  1.0 + 0.1 * jax.random.normal(ks[2], (dim, 1), jnp.float32),
        "gn_b":  0.1 * jax.random.normal(ks[3], (dim, 1), jnp.float32),
        "w_pw":  u(ks[4], (H, dim), 1.0 / np.sqrt(dim)),
        "b_pw":  u(ks[5], (H, 1), 1.0 / np.sqrt(dim)),
        "w_p":   u(ks[6], (H, H), 1.0 / np.sqrt(H)),
        "b_p":   u(ks[7], (H, 1), 1.0 / np.sqrt(H)),
        "w_dwh": u(ks[8], (H, 3), 1.0 / np.sqrt(3.0)),
        "b_dwh": u(ks[9], (H, 1), 1.0 / np.sqrt(3.0)),
        # nn.Parameter zeros in the module; small nonzero values so the Nt/Nc
        # fuse branch is actually exercised numerically.
        "gamma": 0.1 * jax.random.normal(ks[10], (H, 1), jnp.float32),
        "beta":  0.1 * jax.random.normal(ks[11], (H, 1), jnp.float32),
    }


if __name__ == "__main__":
    B, dim, T = 4, 16, 128        # C=16, H=8
    key = jax.random.PRNGKey(0)
    kx, kp = jax.random.split(key)
    x = jax.random.normal(kx, (B, dim, T), jnp.float32)
    params = make_params(dim, kp)

    out = jax.block_until_ready(ctrn_fuse(x, params))
    assert out.shape == (B, dim // 2, T)

    # Check against a reference using the kernel's mixed-precision
    # (bf16-in / f32-accumulate) matmul policy.
    ref_mixed = jax.block_until_ready(
        ctrn_fuse_ref(x, params, mxu_dtype=jnp.bfloat16))
    np.testing.assert_allclose(np.asarray(out), np.asarray(ref_mixed),
                               rtol=3e-2, atol=3e-2)

    # Sanity check against the exact f32 module semantics (bf16 MXU inputs add
    # percent-level absolute deviation at these magnitudes).
    ref_f32 = jax.block_until_ready(ctrn_fuse_ref(x, params))
    np.testing.assert_allclose(np.asarray(out), np.asarray(ref_f32),
                               rtol=1e-1, atol=1e-1)

    print("KERNEL_OK")
</pallas_src>

<mosaic_0001>
module attributes {stable_mosaic.version = 11 : i64} {
  func.func @ctrn_fuse_kernel(%arg0: i32, %arg1: memref<4x16x128xf32, #tpu.memory_space<vmem>>, %arg2: memref<16x6xf32, #tpu.memory_space<vmem>>, %arg3: memref<8x8xf32, #tpu.memory_space<vmem>>, %arg4: memref<8x16xbf16, #tpu.memory_space<vmem>>, %arg5: memref<8x8xbf16, #tpu.memory_space<vmem>>, %arg6: memref<4x8x128xf32, #tpu.memory_space<vmem>>) attributes {dimension_semantics = [#tpu.dimension_semantics<parallel>], iteration_bounds = array<i64: 1>, scalar_prefetch = 0 : i64, scratch_operands = 0 : i64, tpu.core_type = #tpu.core_type<tc>, window_params = [{transform_indices = @transform_0, window_bounds = array<i64: 4, 16, 128>}, {pipeline_mode = #tpu.pipeline_mode<synchronous>, transform_indices = @transform_1, window_bounds = array<i64: 16, 6>}, {pipeline_mode = #tpu.pipeline_mode<synchronous>, transform_indices = @transform_2, window_bounds = array<i64: 8, 8>}, {pipeline_mode = #tpu.pipeline_mode<synchronous>, transform_indices = @transform_3, window_bounds = array<i64: 8, 16>}, {pipeline_mode = #tpu.pipeline_mode<synchronous>, transform_indices = @transform_4, window_bounds = array<i64: 8, 8>}, {transform_indices = @transform_5, window_bounds = array<i64: 4, 8, 128>}]} {
    %c0 = arith.constant 0 : index
    %c0_0 = arith.constant 0 : index
    %c0_1 = arith.constant 0 : index
    %0 = vector.load %arg1[%c0, %c0_0, %c0_1] : memref<4x16x128xf32, #tpu.memory_space<vmem>>, vector<4x16x128xf32>
    %c0_2 = arith.constant 0 : index
    %c0_3 = arith.constant 0 : index
    %1 = vector.load %arg2[%c0_2, %c0_3] : memref<16x6xf32, #tpu.memory_space<vmem>>, vector<16x6xf32>
    %c0_4 = arith.constant 0 : index
    %c0_5 = arith.constant 0 : index
    %2 = vector.load %arg3[%c0_4, %c0_5] : memref<8x8xf32, #tpu.memory_space<vmem>>, vector<8x8xf32>
    %3 = vector.extract_strided_slice %1 {offsets = [0, 0], sizes = [16, 3], strides = [1, 1]} : vector<16x6xf32> to vector<16x3xf32>
    %4 = vector.extract_strided_slice %1 {offsets = [0, 3], sizes = [16, 1], strides = [1, 1]} : vector<16x6xf32> to vector<16x1xf32>
    %5 = vector.shape_cast %4 : vector<16x1xf32> to vector<1x16x1xf32>
    %6 = vector.extract_strided_slice %1 {offsets = [0, 4], sizes = [16, 1], strides = [1, 1]} : vector<16x6xf32> to vector<16x1xf32>
    %7 = vector.shape_cast %6 : vector<16x1xf32> to vector<1x16x1xf32>
    %8 = vector.extract_strided_slice %1 {offsets = [0, 5], sizes = [16, 1], strides = [1, 1]} : vector<16x6xf32> to vector<16x1xf32>
    %9 = vector.shape_cast %8 : vector<16x1xf32> to vector<1x16x1xf32>
    %10 = vector.extract_strided_slice %2 {offsets = [0, 0], sizes = [8, 3], strides = [1, 1]} : vector<8x8xf32> to vector<8x3xf32>
    %11 = vector.extract_strided_slice %2 {offsets = [0, 3], sizes = [8, 1], strides = [1, 1]} : vector<8x8xf32> to vector<8x1xf32>
    %12 = vector.shape_cast %11 : vector<8x1xf32> to vector<1x8x1xf32>
    %13 = vector.extract_strided_slice %2 {offsets = [0, 4], sizes = [8, 1], strides = [1, 1]} : vector<8x8xf32> to vector<8x1xf32>
    %14 = vector.shape_cast %13 : vector<8x1xf32> to vector<1x8x1xf32>
    %15 = vector.extract_strided_slice %2 {offsets = [0, 5], sizes = [8, 1], strides = [1, 1]} : vector<8x8xf32> to vector<8x1xf32>
    %16 = vector.shape_cast %15 : vector<8x1xf32> to vector<1x8x1xf32>
    %17 = vector.extract_strided_slice %2 {offsets = [0, 6], sizes = [8, 1], strides = [1, 1]} : vector<8x8xf32> to vector<8x1xf32>
    %18 = vector.shape_cast %17 : vector<8x1xf32> to vector<1x8x1xf32>
    %19 = vector.extract_strided_slice %2 {offsets = [0, 7], sizes = [8, 1], strides = [1, 1]} : vector<8x8xf32> to vector<8x1xf32>
    %20 = vector.shape_cast %19 : vector<8x1xf32> to vector<1x8x1xf32>
    %21 = tpu.iota {dimensions = array<i32: 0>} : vector<128x128xi32>
    %22 = tpu.iota {dimensions = array<i32: 1>} : vector<128x128xi32>
    %c1_i32 = arith.constant 1 : i32
    %23 = vector.broadcast %c1_i32 : i32 to vector<128x128xi32>
    %24 = arith.addi %21, %23 : vector<128x128xi32>
    %25 = arith.cmpi eq, %22, %24 : vector<128x128xi32>
    %cst = arith.constant 1.000000e+00 : f32
    %cst_6 = arith.constant 0.000000e+00 : f32
    %26 = vector.broadcast %cst : f32 to vector<128x128xf32>
    %27 = vector.broadcast %cst_6 : f32 to vector<128x128xf32>
    %28 = arith.select %25, %26, %27 : vector<128x128xi1>, vector<128x128xf32>
    %c1_i32_7 = arith.constant 1 : i32
    %29 = vector.broadcast %c1_i32_7 : i32 to vector<128x128xi32>
    %30 = arith.addi %22, %29 : vector<128x128xi32>
    %31 = arith.cmpi eq, %30, %21 : vector<128x128xi32>
    %cst_8 = arith.constant 1.000000e+00 : f32
    %cst_9 = arith.constant 0.000000e+00 : f32
    %32 = vector.broadcast %cst_8 : f32 to vector<128x128xf32>
    %33 = vector.broadcast %cst_9 : f32 to vector<128x128xf32>
    %34 = arith.select %31, %32, %33 : vector<128x128xi1>, vector<128x128xf32>
    %35 = vector.shape_cast %28 : vector<128x128xf32> to vector<1x128x128xf32>
    %36 = vector.broadcast %35 : vector<1x128x128xf32> to vector<4x128x128xf32>
    %37 = vector.shape_cast %34 : vector<128x128xf32> to vector<1x128x128xf32>
    %38 = vector.broadcast %37 : vector<1x128x128xf32> to vector<4x128x128xf32>
    %c0_10 = arith.constant 0 : index
    %c0_11 = arith.constant 0 : index
    %39 = vector.load %arg4[%c0_10, %c0_11] : memref<8x16xbf16, #tpu.memory_space<vmem>>, vector<8x16xbf16>
    %40 = vector.shape_cast %39 : vector<8x16xbf16> to vector<1x8x16xbf16>
    %41 = vector.broadcast %40 : vector<1x8x16xbf16> to vector<4x8x16xbf16>
    %c0_12 = arith.constant 0 : index
    %c0_13 = arith.constant 0 : index
    %42 = vector.load %arg5[%c0_12, %c0_13] : memref<8x8xbf16, #tpu.memory_space<vmem>>, vector<8x8xbf16>
    %43 = vector.shape_cast %42 : vector<8x8xbf16> to vector<1x8x8xbf16>
    %44 = vector.broadcast %43 : vector<1x8x8xbf16> to vector<4x8x8xbf16>
    %cst_14 = arith.constant dense<0.000000e+00> : vector<4x16x128xf32>
    %45 = tpu.matmul %0, %36, %cst_14 {dimension_numbers = #tpu.dot_dimension_numbers<[2], [1], [1], [2], [0, 0, 0, 1, 1, 2], [0], [0]>} : vector<4x16x128xf32>, vector<4x128x128xf32>, vector<4x16x128xf32> -> vector<4x16x128xf32>
    %cst_15 = arith.constant dense<0.000000e+00> : vector<4x16x128xf32>
    %46 = tpu.matmul %0, %38, %cst_15 {dimension_numbers = #tpu.dot_dimension_numbers<[2], [1], [1], [2], [0, 0, 0, 1, 1, 2], [0], [0]>} : vector<4x16x128xf32>, vector<4x128x128xf32>, vector<4x16x128xf32> -> vector<4x16x128xf32>
    %47 = vector.extract_strided_slice %3 {offsets = [0, 0], sizes = [16, 1], strides = [1, 1]} : vector<16x3xf32> to vector<16x1xf32>
    %48 = vector.shape_cast %47 : vector<16x1xf32> to vector<1x16x1xf32>
    %49 = vector.extract_strided_slice %3 {offsets = [0, 1], sizes = [16, 1], strides = [1, 1]} : vector<16x3xf32> to vector<16x1xf32>
    %50 = vector.shape_cast %49 : vector<16x1xf32> to vector<1x16x1xf32>
    %51 = vector.extract_strided_slice %3 {offsets = [0, 2], sizes = [16, 1], strides = [1, 1]} : vector<16x3xf32> to vector<16x1xf32>
    %52 = vector.shape_cast %51 : vector<16x1xf32> to vector<1x16x1xf32>
    %53 = vector.broadcast %48 : vector<1x16x1xf32> to vector<4x16x128xf32>
    %54 = arith.mulf %53, %45 : vector<4x16x128xf32>
    %55 = vector.broadcast %50 : vector<1x16x1xf32> to vector<4x16x128xf32>
    %56 = arith.mulf %55, %0 : vector<4x16x128xf32>
    %57 = arith.addf %54, %56 : vector<4x16x128xf32>
    %58 = vector.broadcast %52 : vector<1x16x1xf32> to vector<4x16x128xf32>
    %59 = arith.mulf %58, %46 : vector<4x16x128xf32>
    %60 = arith.addf %57, %59 : vector<4x16x128xf32>
    %61 = vector.broadcast %5 : vector<1x16x1xf32> to vector<4x16x128xf32>
    %62 = arith.addf %60, %61 : vector<4x16x128xf32>
    %cst_16 = arith.constant 1.000000e+00 : f32
    %63 = vector.broadcast %cst_16 : f32 to vector<4x1x16xf32>
    %cst_17 = arith.constant dense<0.000000e+00> : vector<4x1x128xf32>
    %64 = tpu.matmul %63, %62, %cst_17 {dimension_numbers = #tpu.dot_dimension_numbers<[2], [1], [1], [2], [0, 0, 0, 1, 1, 2], [0], [0]>} : vector<4x1x16xf32>, vector<4x16x128xf32>, vector<4x1x128xf32> -> vector<4x1x128xf32>
    %cst_18 = arith.constant dense<0.000000e+00> : vector<4x1xf32>
    %65 = vector.multi_reduction <add>, %64, %cst_18 [2] : vector<4x1x128xf32> to vector<4x1xf32>
    %66 = vector.shape_cast %65 : vector<4x1xf32> to vector<4x1x1xf32>
    %cst_19 = arith.constant 4.8828125E-4 : f32
    %67 = vector.broadcast %cst_19 : f32 to vector<4x1x1xf32>
    %68 = arith.mulf %66, %67 : vector<4x1x1xf32>
    %69 = vector.broadcast %68 : vector<4x1x1xf32> to vector<4x16x128xf32>
    %70 = arith.subf %62, %69 : vector<4x16x128xf32>
    %71 = arith.mulf %70, %70 : vector<4x16x128xf32>
    %cst_20 = arith.constant 1.000000e+00 : f32
    %72 = vector.broadcast %cst_20 : f32 to vector<4x1x16xf32>
    %cst_21 = arith.constant dense<0.000000e+00> : vector<4x1x128xf32>
    %73 = tpu.matmul %72, %71, %cst_21 {dimension_numbers = #tpu.dot_dimension_numbers<[2], [1], [1], [2], [0, 0, 0, 1, 1, 2], [0], [0]>} : vector<4x1x16xf32>, vector<4x16x128xf32>, vector<4x1x128xf32> -> vector<4x1x128xf32>
    %cst_22 = arith.constant dense<0.000000e+00> : vector<4x1xf32>
    %74 = vector.multi_reduction <add>, %73, %cst_22 [2] : vector<4x1x128xf32> to vector<4x1xf32>
    %75 = vector.shape_cast %74 : vector<4x1xf32> to vector<4x1x1xf32>
    %cst_23 = arith.constant 4.8828125E-4 : f32
    %76 = vector.broadcast %cst_23 : f32 to vector<4x1x1xf32>
    %77 = arith.mulf %75, %76 : vector<4x1x1xf32>
    %cst_24 = arith.constant 9.99999993E-9 : f32
    %78 = vector.broadcast %cst_24 : f32 to vector<4x1x1xf32>
    %79 = arith.addf %77, %78 : vector<4x1x1xf32>
    %80 = math.rsqrt %79 : vector<4x1x1xf32>
    %81 = vector.broadcast %80 : vector<4x1x1xf32> to vector<4x16x128xf32>
    %82 = arith.mulf %70, %81 : vector<4x16x128xf32>
    %83 = vector.broadcast %7 : vector<1x16x1xf32> to vector<4x16x128xf32>
    %84 = arith.mulf %82, %83 : vector<4x16x128xf32>
    %85 = vector.broadcast %9 : vector<1x16x1xf32> to vector<4x16x128xf32>
    %86 = arith.addf %84, %85 : vector<4x16x128xf32>
    %87 = arith.truncf %86 : vector<4x16x128xf32> to vector<4x16x128xbf16>
    %cst_25 = arith.constant dense<0.000000e+00> : vector<4x8x128xf32>
    %88 = tpu.matmul %41, %87, %cst_25 {dimension_numbers = #tpu.dot_dimension_numbers<[2], [1], [1], [2], [0, 0, 0, 1, 1, 2], [0], [0]>} : vector<4x8x16xbf16>, vector<4x16x128xbf16>, vector<4x8x128xf32> -> vector<4x8x128xf32>
    %89 = vector.broadcast %14 : vector<1x8x1xf32> to vector<4x8x128xf32>
    %90 = arith.addf %88, %89 : vector<4x8x128xf32>
    %cst_26 = arith.constant 5.000000e-01 : f32
    %91 = vector.broadcast %cst_26 : f32 to vector<4x8x128xf32>
    %92 = arith.mulf %91, %90 : vector<4x8x128xf32>
    %cst_27 = arith.constant 0.707106769 : f32
    %93 = vector.broadcast %cst_27 : f32 to vector<4x8x128xf32>
    %94 = arith.mulf %90, %93 : vector<4x8x128xf32>
    %95 = math.absf %94 : vector<4x8x128xf32>
    %cst_28 = arith.constant 0.327591091 : f32
    %96 = vector.broadcast %cst_28 : f32 to vector<4x8x128xf32>
    %97 = arith.mulf %96, %95 : vector<4x8x128xf32>
    %cst_29 = arith.constant 1.000000e+00 : f32
    %98 = vector.broadcast %cst_29 : f32 to vector<4x8x128xf32>
    %99 = arith.addf %98, %97 : vector<4x8x128xf32>
    %100 = tpu.reciprocal %99 {approx = true} : vector<4x8x128xf32> -> vector<4x8x128xf32>
    %cst_30 = arith.constant 1.06140542 : f32
    %101 = vector.broadcast %cst_30 : f32 to vector<4x8x128xf32>
    %102 = arith.mulf %101, %100 : vector<4x8x128xf32>
    %cst_31 = arith.constant -1.45315206 : f32
    %103 = vector.broadcast %cst_31 : f32 to vector<4x8x128xf32>
    %104 = arith.addf %102, %103 : vector<4x8x128xf32>
    %105 = arith.mulf %104, %100 : vector<4x8x128xf32>
    %cst_32 = arith.constant 1.42141378 : f32
    %106 = vector.broadcast %cst_32 : f32 to vector<4x8x128xf32>
    %107 = arith.addf %105, %106 : vector<4x8x128xf32>
    %108 = arith.mulf %107, %100 : vector<4x8x128xf32>
    %cst_33 = arith.constant -0.284496725 : f32
    %109 = vector.broadcast %cst_33 : f32 to vector<4x8x128xf32>
    %110 = arith.addf %108, %109 : vector<4x8x128xf32>
    %111 = arith.mulf %110, %100 : vector<4x8x128xf32>
    %cst_34 = arith.constant 0.254829586 : f32
    %112 = vector.broadcast %cst_34 : f32 to vector<4x8x128xf32>
    %113 = arith.addf %111, %112 : vector<4x8x128xf32>
    %114 = arith.mulf %113, %100 : vector<4x8x128xf32>
    %115 = arith.mulf %95, %95 : vector<4x8x128xf32>
    %cst_35 = arith.constant 0.000000e+00 : f32
    %116 = vector.broadcast %cst_35 : f32 to vector<4x8x128xf32>
    %117 = arith.subf %116, %115 : vector<4x8x128xf32>
    %118 = math.exp %117 : vector<4x8x128xf32>
    %119 = arith.mulf %114, %118 : vector<4x8x128xf32>
    %cst_36 = arith.constant 1.000000e+00 : f32
    %120 = vector.broadcast %cst_36 : f32 to vector<4x8x128xf32>
    %121 = arith.subf %120, %119 : vector<4x8x128xf32>
    %cst_37 = arith.constant 0.000000e+00 : f32
    %122 = vector.broadcast %cst_37 : f32 to vector<4x8x128xf32>
    %123 = arith.cmpf olt, %94, %122 : vector<4x8x128xf32>
    %cst_38 = arith.constant 0.000000e+00 : f32
    %124 = vector.broadcast %cst_38 : f32 to vector<4x8x128xf32>
    %125 = arith.subf %124, %121 : vector<4x8x128xf32>
    %126 = arith.select %123, %125, %121 : vector<4x8x128xi1>, vector<4x8x128xf32>
    %cst_39 = arith.constant 1.000000e+00 : f32
    %127 = vector.broadcast %cst_39 : f32 to vector<4x8x128xf32>
    %128 = arith.addf %127, %126 : vector<4x8x128xf32>
    %129 = arith.mulf %92, %128 : vector<4x8x128xf32>
    %130 = arith.truncf %129 : vector<4x8x128xf32> to vector<4x8x128xbf16>
    %cst_40 = arith.constant dense<0.000000e+00> : vector<4x8x128xf32>
    %131 = tpu.matmul %44, %130, %cst_40 {dimension_numbers = #tpu.dot_dimension_numbers<[2], [1], [1], [2], [0, 0, 0, 1, 1, 2], [0], [0]>} : vector<4x8x8xbf16>, vector<4x8x128xbf16>, vector<4x8x128xf32> -> vector<4x8x128xf32>
    %132 = vector.broadcast %16 : vector<1x8x1xf32> to vector<4x8x128xf32>
    %133 = arith.addf %131, %132 : vector<4x8x128xf32>
    %134 = arith.mulf %133, %133 : vector<4x8x128xf32>
    %cst_41 = arith.constant 1.000000e+00 : f32
    %135 = vector.broadcast %cst_41 : f32 to vector<4x1x8xf32>
    %cst_42 = arith.constant dense<0.000000e+00> : vector<4x1x128xf32>
    %136 = tpu.matmul %135, %134, %cst_42 {dimension_numbers = #tpu.dot_dimension_numbers<[2], [1], [1], [2], [0, 0, 0, 1, 1, 2], [0], [0]>} : vector<4x1x8xf32>, vector<4x8x128xf32>, vector<4x1x128xf32> -> vector<4x1x128xf32>
    %137 = math.sqrt %136 : vector<4x1x128xf32>
    %cst_43 = arith.constant 9.99999997E-7 : f32
    %138 = vector.broadcast %cst_43 : f32 to vector<4x1x128xf32>
    %139 = arith.addf %137, %138 : vector<4x1x128xf32>
    %140 = tpu.reciprocal %139 {approx = true} : vector<4x1x128xf32> -> vector<4x1x128xf32>
    %141 = arith.mulf %137, %140 : vector<4x1x128xf32>
    %cst_44 = arith.constant dense<0.000000e+00> : vector<4x8x128xf32>
    %142 = tpu.matmul %129, %36, %cst_44 {dimension_numbers = #tpu.dot_dimension_numbers<[2], [1], [1], [2], [0, 0, 0, 1, 1, 2], [0], [0]>} : vector<4x8x128xf32>, vector<4x128x128xf32>, vector<4x8x128xf32> -> vector<4x8x128xf32>
    %cst_45 = arith.constant dense<0.000000e+00> : vector<4x8x128xf32>
    %143 = tpu.matmul %129, %38, %cst_45 {dimension_numbers = #tpu.dot_dimension_numbers<[2], [1], [1], [2], [0, 0, 0, 1, 1, 2], [0], [0]>} : vector<4x8x128xf32>, vector<4x128x128xf32>, vector<4x8x128xf32> -> vector<4x8x128xf32>
    %144 = vector.extract_strided_slice %10 {offsets = [0, 0], sizes = [8, 1], strides = [1, 1]} : vector<8x3xf32> to vector<8x1xf32>
    %145 = vector.shape_cast %144 : vector<8x1xf32> to vector<1x8x1xf32>
    %146 = vector.extract_strided_slice %10 {offsets = [0, 1], sizes = [8, 1], strides = [1, 1]} : vector<8x3xf32> to vector<8x1xf32>
    %147 = vector.shape_cast %146 : vector<8x1xf32> to vector<1x8x1xf32>
    %148 = vector.extract_strided_slice %10 {offsets = [0, 2], sizes = [8, 1], strides = [1, 1]} : vector<8x3xf32> to vector<8x1xf32>
    %149 = vector.shape_cast %148 : vector<8x1xf32> to vector<1x8x1xf32>
    %150 = vector.broadcast %145 : vector<1x8x1xf32> to vector<4x8x128xf32>
    %151 = arith.mulf %150, %142 : vector<4x8x128xf32>
    %152 = vector.broadcast %147 : vector<1x8x1xf32> to vector<4x8x128xf32>
    %153 = arith.mulf %152, %129 : vector<4x8x128xf32>
    %154 = arith.addf %151, %153 : vector<4x8x128xf32>
    %155 = vector.broadcast %149 : vector<1x8x1xf32> to vector<4x8x128xf32>
    %156 = arith.mulf %155, %143 : vector<4x8x128xf32>
    %157 = arith.addf %154, %156 : vector<4x8x128xf32>
    %158 = vector.broadcast %12 : vector<1x8x1xf32> to vector<4x8x128xf32>
    %159 = arith.addf %157, %158 : vector<4x8x128xf32>
    %160 = arith.mulf %159, %159 : vector<4x8x128xf32>
    %cst_46 = arith.constant dense<0.000000e+00> : vector<4x8xf32>
    %161 = vector.multi_reduction <add>, %160, %cst_46 [2] : vector<4x8x128xf32> to vector<4x8xf32>
    %162 = vector.shape_cast %161 : vector<4x8xf32> to vector<4x8x1xf32>
    %163 = math.sqrt %162 : vector<4x8x1xf32>
    %cst_47 = arith.constant 9.99999997E-7 : f32
    %164 = vector.broadcast %cst_47 : f32 to vector<4x8x1xf32>
    %165 = arith.addf %163, %164 : vector<4x8x1xf32>
    %166 = tpu.reciprocal %165 {approx = true} : vector<4x8x1xf32> -> vector<4x8x1xf32>
    %167 = arith.mulf %163, %166 : vector<4x8x1xf32>
    %168 = vector.broadcast %141 : vector<4x1x128xf32> to vector<4x8x128xf32>
    %169 = arith.mulf %129, %168 : vector<4x8x128xf32>
    %170 = vector.broadcast %167 : vector<4x8x1xf32> to vector<4x8x128xf32>
    %171 = arith.mulf %169, %170 : vector<4x8x128xf32>
    %172 = vector.broadcast %18 : vector<1x8x1xf32> to vector<4x8x128xf32>
    %173 = arith.mulf %172, %171 : vector<4x8x128xf32>
    %174 = vector.broadcast %20 : vector<1x8x1xf32> to vector<4x8x128xf32>
    %175 = arith.addf %173, %174 : vector<4x8x128xf32>
    %176 = arith.addf %175, %129 : vector<4x8x128xf32>
    %177 = arith.truncf %176 : vector<4x8x128xf32> to vector<4x8x128xbf16>
    %cst_48 = arith.constant dense<0.000000e+00> : vector<4x8x128xf32>
    %178 = tpu.matmul %44, %177, %cst_48 {dimension_numbers = #tpu.dot_dimension_numbers<[2], [1], [1], [2], [0, 0, 0, 1, 1, 2], [0], [0]>} : vector<4x8x8xbf16>, vector<4x8x128xbf16>, vector<4x8x128xf32> -> vector<4x8x128xf32>
    %179 = vector.broadcast %16 : vector<1x8x1xf32> to vector<4x8x128xf32>
    %180 = arith.addf %178, %179 : vector<4x8x128xf32>
    %c0_49 = arith.constant 0 : index
    %c0_50 = arith.constant 0 : index
    %c0_51 = arith.constant 0 : index
    %181 = vector.load %arg6[%c0_49, %c0_50, %c0_51] : memref<4x8x128xf32, #tpu.memory_space<vmem>>, vector<4x8x128xf32>
    tpu.vector_store %arg6[%c0_49, %c0_50, %c0_51], %180 {strides = array<i32>} : memref<4x8x128xf32, #tpu.memory_space<vmem>>, vector<4x8x128xf32>,
    return
  }
  func.func @transform_0(%arg0: i32) -> (i32, i32, i32) {
    %c0_i32 = arith.constant 0 : i32
    %c0_i32_0 = arith.constant 0 : i32
    %c0_i32_1 = arith.constant 0 : i32
    return %arg0, %c0_i32, %c0_i32_0 : i32, i32, i32
  }
  func.func @transform_1(%arg0: i32) -> (i32, i32) {
    %c0_i32 = arith.constant 0 : i32
    %c0_i32_0 = arith.constant 0 : i32
    %c0_i32_1 = arith.constant 0 : i32
    return %c0_i32, %c0_i32_0 : i32, i32
  }
  func.func @transform_2(%arg0: i32) -> (i32, i32) {
    %c0_i32 = arith.constant 0 : i32
    %c0_i32_0 = arith.constant 0 : i32
    %c0_i32_1 = arith.constant 0 : i32
    return %c0_i32, %c0_i32_0 : i32, i32
  }
  func.func @transform_3(%arg0: i32) -> (i32, i32) {
    %c0_i32 = arith.constant 0 : i32
    %c0_i32_0 = arith.constant 0 : i32
    %c0_i32_1 = arith.constant 0 : i32
    return %c0_i32, %c0_i32_0 : i32, i32
  }
  func.func @transform_4(%arg0: i32) -> (i32, i32) {
    %c0_i32 = arith.constant 0 : i32
    %c0_i32_0 = arith.constant 0 : i32
    %c0_i32_1 = arith.constant 0 : i32
    return %c0_i32, %c0_i32_0 : i32, i32
  }
  func.func @transform_5(%arg0: i32) -> (i32, i32, i32) {
    %c0_i32 = arith.constant 0 : i32
    %c0_i32_0 = arith.constant 0 : i32
    %c0_i32_1 = arith.constant 0 : i32
    return %arg0, %c0_i32, %c0_i32_0 : i32, i32, i32
  }
}

</mosaic_0001>

<bundles_post_ra>
// kernel: tpu_custom_call.1
= control target key start
LH: loop header
LB: loop body
LE: loop exit
PB: predicated region body
PF: predicated region fallthrough
CT: control target
= control target key end

     0   :  { %10 = vsyncpa [#allocation3], 0  ;;  %s6492_s0 = inlined_call_operand.hbm [shape: f32[4,16,128], index: 0, kind: input, shape index: {}]   ;;  %s6493_s1 = inlined_call_operand.vmem [shape: f32[16,6], index: 1, kind: input, shape index: {}]   ;;  %s6494_s2 = inlined_call_operand.vmem [shape: f32[8,8], index: 2, kind: input, shape index: {}]   ;;  %s6495_s3 = inlined_call_operand.vmem [shape: bf16[8,16], index: 3, kind: input, shape index: {}]   ;;  %s6496_s4 = inlined_call_operand.vmem [shape: bf16[8,8], index: 4, kind: input, shape index: {}]   ;;  %s6497_s5 = inlined_call_operand.hbm [shape: f32[4,8,128], index: 5, kind: output, shape index: {}]  }
   0x1   :  { %11 = vsyncpa [#allocation4], 0  ;;  %s5138_s18 = smov [#allocation2]   ;;  %s5090_s22 = scalar_lea.hbm %s6492_s0, 1024 }
   0x2   :  { %s17_s19 = sshll.u32 %s5138_s18, 4  ;;  %p5091_p0 = scmp.ne.s32.totalorder %s6492_s0, %s5090_s22  ;;  %s18_s19 = int_to_ptr.vmem [resolvable:$true] %s17_s19 }
   0x3   :  { %p5094_p1 = scmp.lt.u32.totalorder %s5090_s22, %s6492_s0 }
   0x5   :  { %p5096_p2 = pnand %p5094_p1, %p5091_p0 }
   0x7   :  { %5099 = shalt.err (!%p5096_p2)
}
   0x8   :  { %s5100_s27 = scalar_lea.vmem %s18_s19, 1024  ;;  %p5105_p4 = scmp.lt.s32.totalorder %s18_s19, %s18_s19 }
   0x9   :  { %p5101_p3 = scmp.ne.s32.totalorder %s18_s19, %s5100_s27  ;;  %p5106_p5 = scmp.lt.s32.totalorder %s5100_s27, %s5100_s27 }
   0xb   :  { %p5107_p6 = por %p5106_p5, %p5105_p4 }
   0xd   :  { %p5108_p7 = pnand %p5107_p6, %p5101_p3 }
   0xf   :  { %5111 = shalt.err (!%p5108_p7)
}
  0x10   :  { %s5139_s28 = smov 128   ;;  %s5140_s29 = smov 8   ;;  %v47_v0 = vlaneseq }
  0x11   :  { %23 = dma.hbm_to_vmem [thread:$0]  %s6492_s0, 1024, %s18_s19, [#allocation3], %s5139_s28, %s5139_s28, %s5140_s29  }
  0x12   :  { %5134 = dma.done.wait [#allocation3], 1024  }
  0x13   :  { %5135 = vsyncadd [#allocation3], 4294966272  ;;  %v5141_v1 = vmov 1   ;;  %v5142_v2 = vmov 0   ;;  %v5202_v3 = vshrl.u32 %v47_v0, 7  ;;  %v5204_v4 = vand.u32 127, %v47_v0 }
  0x14   :  { %5018 = vset.pattern.permute.xlu1 %v5141_v1  ;;  %5017 = vset.pattern.permute.xlu0 %v5142_v2  ;;  %v5234_v18 = vld [vmem:[#allocation2] sm:$0xff]  ;;  %v5243_v20 = vld [vmem:[#allocation2 + $0x10] sm:$0xff]  ;;  %v6506_v24 = vmov 1.0|1.0   ;;  %v5307_v35 = vld [vmem:[%s6493_s1 + $0x8] sm:$0xff]  ;;  %v6524_v37 = vmov 0 }
  0x15   :  { %v5207_v5 = vadd.s32 8, %v5202_v3  ;;  %v66_v6 = vadd.s32 1, %v5202_v3  ;;  %v5211_v7 = vadd.s32 16, %v5202_v3  ;;  %v5214_v8 = vadd.s32 24, %v5202_v3  ;;  %3852 = vmatprep.mubr.f32.mxu0 %v5234_v18  ;;  %3887 = vmatprep.mubr.f32.mxu1 %v5243_v20  ;;  %v5276_v29 = vld [vmem:[%s6493_s1] sm:$0xff]  ;;  %v5508_v59 = vld [vmem:[#allocation2 + $0x8] sm:$0xff] }
  0x16   :  { %v5217_v9 = vadd.s32 32, %v5202_v3  ;;  %v5220_v10 = vadd.s32 40, %v5202_v3  ;;  %v5223_v11 = vadd.s32 48, %v5202_v3  ;;  %v5226_v12 = vadd.s32 56, %v5202_v3  ;;  %768 = vperm.xlu1 %5018, %v5276_v29   ;;  %751 = vperm.xlu0 %5017, %v5276_v29   ;;  %v5510_v60 = vld [vmem:[#allocation2 + $0x18] sm:$0xff]  ;;  %v5520_v61 = vld [vmem:[#allocation2 + $0x20] sm:$0xff] }
  0x17   :  { %v67_v13 = vadd.s32 1, %v5207_v5  ;;  %vm82_vm0 = vcmp.eq.s32.totalorder %v5204_v4, %v66_v6  ;;  %v68_v14 = vadd.s32 1, %v5211_v7  ;;  %v69_v15 = vadd.s32 1, %v5214_v8  ;;  %v5522_v62 = vld [vmem:[#allocation2 + $0x30] sm:$0xff]  ;;  %v5624_v0 = vld [vmem:[#allocation2 + $0x28] sm:$0xff] }
  0x18   :  { %v70_v16 = vadd.s32 1, %v5217_v9  ;;  %v71_v17 = vadd.s32 1, %v5220_v10  ;;  %v5240_v19 = vadd.s32 64, %v5202_v3  ;;  %v72_v22 = vadd.s32 1, %v5223_v11 }
  0x19   :  { %vm83_vm1 = vcmp.eq.s32.totalorder %v5204_v4, %v67_v13  ;;  %vm84_vm2 = vcmp.eq.s32.totalorder %v5204_v4, %v68_v14  ;;  %vm85_vm3 = vcmp.eq.s32.totalorder %v5204_v4, %v69_v15  ;;  %v73_v23 = vadd.s32 1, %v5226_v12 }
  0x1a   :  { %vm5245_vm4 = vmpackc.low %vm83_vm1, %vm82_vm0  ;;  %vm86_vm5 = vcmp.eq.s32.totalorder %v5204_v4, %v70_v16  ;;  %vm87_vm7 = vcmp.eq.s32.totalorder %v5204_v4, %v71_v17  ;;  %v5265_v26 = vadd.s32 72, %v5202_v3  ;;  %v5268_v27 = vadd.s32 80, %v5202_v3  ;;  %772 = vperm.xlu1 %5018, %v5307_v35   ;;  %756 = vperm.xlu0 %5017, %v5307_v35  }
  0x1b   :  { %4529 = vmatprep.subr.msk.bf16.mxu0 %vm5245_vm4, %v6506_v24  ;;  %4561 = vmatprep.subr.msk.bf16.mxu1 %vm5245_vm4, %v6506_v24  ;;  %vm5259_vm6 = vmpackc.low %vm85_vm3, %vm84_vm2  ;;  %v5271_v28 = vadd.s32 88, %v5202_v3  ;;  %v74_v30 = vadd.s32 1, %v5240_v19  ;;  %vm88_vm9 = vcmp.eq.s32.totalorder %v5204_v4, %v72_v22  ;;  %vm89_vm10 = vcmp.eq.s32.totalorder %v5204_v4, %v73_v23 }
  0x1c   :  { %4531 = vmatpush3.bf16.msk.msra.mxu0 %vm5245_vm4, %v6506_v24  ;;  %4563 = vmatpush3.bf16.msk.msra.mxu1 %vm5245_vm4, %v6506_v24  ;;  %v75_v31 = vadd.s32 1, %v5265_v26  ;;  %v76_v32 = vadd.s32 1, %v5268_v27  ;;  %vm5296_vm8 = vmpackc.low %vm87_vm7, %vm86_vm5  ;;  %v5318_v36 = vadd.s32 1, %v5204_v4  ;;  %v60_v38 = vadd.s32 96, %v5202_v3 }
  0x1d   :  { %4533 = vmatprep.subr.msk.bf16.mxu0 %vm5259_vm6, %v6506_v24  ;;  %4565 = vmatprep.subr.msk.bf16.mxu1 %vm5259_vm6, %v6506_v24  ;;  %v77_v33 = vadd.s32 1, %v5271_v28  ;;  %vm90_vm11 = vcmp.eq.s32.totalorder %v5204_v4, %v74_v30  ;;  %vm5328_vm15 = vmpackc.low %vm89_vm10, %vm88_vm9  ;;  %v61_v40 = vadd.s32 104, %v5202_v3  ;;  %v6530_v42 = vmov 0 }
  0x1e   :  { %vm91_vm12 = vcmp.eq.s32.totalorder %v5204_v4, %v75_v31  ;;  %vm92_vm13 = vcmp.eq.s32.totalorder %v5204_v4, %v76_v32  ;;  %v6525_v37 = vsel %vm5328_vm15, 4294967295, %v6524_v37  ;;  %vm117_vm0 = vcmp.eq.s32.totalorder %v5318_v36, %v5211_v7 }
  0x1f   :  { %vm93_vm14 = vcmp.eq.s32.totalorder %v5204_v4, %v77_v33  ;;  %vm118_vm1 = vcmp.eq.s32.totalorder %v5318_v36, %v5214_v8  ;;  %vm5338_vm2 = vmpackc.low %vm91_vm12, %vm90_vm11  ;;  %vm119_vm3 = vcmp.eq.s32.totalorder %v5318_v36, %v5217_v9  ;;  %vm120_vm5 = vcmp.eq.s32.totalorder %v5318_v36, %v5220_v10 }
  0x20   :  { %4535 = vmatpush3.bf16.msk.msra.mxu0 %vm5259_vm6, %v6506_v24  ;;  %4567 = vmatpush3.bf16.msk.msra.mxu1 %vm5259_vm6, %v6506_v24  ;;  %vm5354_vm7 = vmpackc.low %vm93_vm14, %vm92_vm13  ;;  %vm121_vm9 = vcmp.eq.s32.totalorder %v5318_v36, %v5223_v11  ;;  %vm122_vm10 = vcmp.eq.s32.totalorder %v5318_v36, %v5226_v12  ;;  %vm123_vm12 = vcmp.eq.s32.totalorder %v5318_v36, %v5240_v19  ;;  %v62_v43 = vadd.s32 112, %v5202_v3 }
  0x21   :  { %4537 = vmatprep.subr.msk.bf16.mxu0 %vm5296_vm8, %v6506_v24  ;;  %4569 = vmatprep.subr.msk.bf16.mxu1 %vm5296_vm8, %v6506_v24  ;;  %vm5371_vm11 = vmpackc.low %vm118_vm1, %vm117_vm0  ;;  %vm124_vm13 = vcmp.eq.s32.totalorder %v5318_v36, %v5265_v26  ;;  %v63_v44 = vadd.s32 120, %v5202_v3  ;;  %v6532_v45 = vmov 0  ;;  %v6509_v46 = vmov 2  }
  0x22   :  { %v6531_v42 = vsel %vm5371_vm11, 4294967295, %v6530_v42  ;;  %vm5384_vm14 = vmpackc.low %vm120_vm5, %vm119_vm3  ;;  %5020 = vset.pattern.permute.xlu1 %v6509_v46  ;;  %v78_v47 = vadd.s32 1, %v60_v38  ;;  %v79_v48 = vadd.s32 1, %v61_v40  ;;  %v6534_v49 = vmov 0  ;;  %5019 = vset.pattern.permute.xlu0 %v6509_v46 }
  0x23   :  { %v6533_v45 = vsel %vm5384_vm14, 4294967295, %v6532_v45  ;;  %vm5399_vm3 = vmpackc.low %vm122_vm10, %vm121_vm9  ;;  %vm127_vm5 = vcmp.eq.s32.totalorder %v5318_v36, %v60_v38  ;;  %vm128_vm0 = vcmp.eq.s32.totalorder %v5318_v36, %v61_v40  ;;  %796 = vperm.xlu1 %5020, %v5307_v35   ;;  %v6536_v50 = vmov 0  ;;  %792 = vperm.xlu0 %5019, %v5276_v29  }
  0x24   :  { %4539 = vmatpush3.bf16.msk.msra.mxu0 %vm5296_vm8, %v6506_v24  ;;  %4571 = vmatpush3.bf16.msk.msra.mxu1 %vm5296_vm8, %v6506_v24  ;;  %v6535_v49 = vsel %vm5399_vm3, 4294967295, %v6534_v49  ;;  %vm5419_vm9 = vmpackc.low %vm124_vm13, %vm123_vm12  ;;  %vm129_vm10 = vcmp.eq.s32.totalorder %v5318_v36, %v62_v43  ;;  %vm130_vm1 = vcmp.eq.s32.totalorder %v5318_v36, %v63_v44  ;;  %vm6538_vm3 = vcmp.eq.s32.totalorder %v5318_v36, %v5268_v27 }
  0x25   :  { %4541 = vmatprep.subr.msk.bf16.mxu0 %vm5328_vm15, %v6506_v24  ;;  %4573 = vmatprep.subr.msk.bf16.mxu1 %vm5328_vm15, %v6506_v24  ;;  %v6537_v50 = vsel %vm5419_vm9, 4294967295, %v6536_v50  ;;  %vm6539_vm12 = vcmp.eq.s32.totalorder %v5318_v36, %v5271_v28  ;;  %v6540_v51 = vmov 0  ;;  %vm5441_vm9 = vmpackc.low %vm128_vm0, %vm127_vm5  ;;  %v6542_v52 = vmov 0 }
  0x26   :  { %vm5437_vm13 = vmpackc.low %vm6539_vm12, %vm6538_vm3  ;;  %v6543_v52 = vsel %vm5441_vm9, 4294967295, %v6542_v52  ;;  %vm94_vm14 = vcmp.eq.s32.totalorder %v5204_v4, %v78_v47  ;;  %vm95_vm11 = vcmp.eq.s32.totalorder %v5204_v4, %v79_v48  ;;  %v80_v53 = vadd.s32 1, %v62_v43 }
  0x27   :  { %v6541_v51 = vsel %vm5437_vm13, 4294967295, %v6540_v51  ;;  %v81_v54 = vadd.s32 1, %v63_v44  ;;  %v6544_v55 = vmov 0  ;;  %v6508_v56 = vmov 3   ;;  %vm5465_vm0 = vmpackc.low %vm95_vm11, %vm94_vm14 }
  0x28   :  { %4543 = vmatpush3.bf16.msk.msra.mxu0 %vm5328_vm15, %v6506_v24  ;;  %4575 = vmatpush3.bf16.msk.msra.mxu1 %vm5328_vm15, %v6506_v24  ;;  %vm5448_vm15 = vmpackc.low %vm130_vm1, %vm129_vm10  ;;  %vm96_vm1 = vcmp.eq.s32.totalorder %v5204_v4, %v80_v53  ;;  %vm6550_vm14 = vnez %v6525_v37  ;;  %vm115_vm5 = vcmp.eq.s32.totalorder %v5318_v36, %v5202_v3  ;;  %vm116_vm10 = vcmp.eq.s32.totalorder %v5318_v36, %v5207_v5 }
  0x29   :  { %4545 = vmatprep.subr.msk.bf16.mxu0 %vm5338_vm2, %v6506_v24  ;;  %4577 = vmatprep.subr.msk.bf16.mxu1 %vm5338_vm2, %v6506_v24  ;;  %v6545_v55 = vsel %vm5448_vm15, 4294967295, %v6544_v55  ;;  %vm97_vm3 = vcmp.eq.s32.totalorder %v5204_v4, %v81_v54  ;;  %vm5614_vm12 = vmpackc.low %vm116_vm10, %vm115_vm5  ;;  %v5626_v4 = vld [vmem:[#allocation2 + $0x38] sm:$0xff]  ;;  %vm6555_vm5 = vnez %v6535_v49  ;;  %vm6556_vm10 = vnez %v6537_v50 }
  0x2a   :  { %5021 = vset.pattern.permute.xlu1 %v6508_v56  ;;  %5022 = vset.pattern.permute.xlu0 %v6508_v56  ;;  %vm5486_vm11 = vmpackc.low %vm97_vm3, %vm96_vm1  ;;  %vm6553_vm1 = vnez %v6531_v42  ;;  %vm6554_vm3 = vnez %v6533_v45  ;;  %v5146_v5 = vmov 0.0|0.0   ;;  %v5148_v6 = vmov 0.0  }
  0x2b   :  { %816 = vperm.xlu1 %5021, %v5276_v29   ;;  %820 = vperm.xlu0 %5022, %v5307_v35  }
  0x2c   :  { %4547 = vmatpush3.bf16.msk.msra.mxu0 %vm5338_vm2, %v6506_v24  ;;  %4579 = vmatpush3.bf16.msk.msra.mxu1 %vm5338_vm2, %v6506_v24 }
  0x2d   :  { %4549 = vmatprep.subr.msk.bf16.mxu0 %vm5354_vm7, %v6506_v24  ;;  %4581 = vmatprep.subr.msk.bf16.mxu1 %vm5354_vm7, %v6506_v24 }
  0x30   :  { %4551 = vmatpush3.bf16.msk.msra.mxu0 %vm5354_vm7, %v6506_v24  ;;  %4583 = vmatpush3.bf16.msk.msra.mxu1 %vm5354_vm7, %v6506_v24 }
  0x31   :  { %4553 = vmatprep.subr.msk.bf16.mxu0 %vm5465_vm0, %v6506_v24  ;;  %4585 = vmatprep.subr.msk.bf16.mxu1 %vm5465_vm0, %v6506_v24 }
  0x34   :  { %4555 = vmatpush3.bf16.msk.msra.mxu0 %vm5465_vm0, %v6506_v24  ;;  %4587 = vmatpush3.bf16.msk.msra.mxu1 %vm5465_vm0, %v6506_v24 }
  0x35   :  { %4557 = vmatprep.subr.msk.bf16.mxu0 %vm5486_vm11, %v6506_v24  ;;  %4589 = vmatprep.subr.msk.bf16.mxu1 %vm5486_vm11, %v6506_v24 }
  0x38   :  { %4559 = vmatpush3.bf16.msk.msra.mxu0 %vm5486_vm11, %v6506_v24  ;;  %4591 = vmatpush3.bf16.msk.msra.mxu1 %vm5486_vm11, %v6506_v24 }
  0x39   :  { %4593 = vmatprep.subr.msk.bf16.mxu0 %vm5245_vm4, %v6506_v24  ;;  %4625 = vmatprep.subr.msk.bf16.mxu1 %vm5245_vm4, %v6506_v24 }
  0x3b   :  { %3853 = vmatmul.mubr.f32.vlgmr.msra.gmra.mrb[0].mxu0 %v5508_v59  ;;  %3888 = vmatmul.mubr.f32.vlgmr.msra.gmra.mrb[0].mxu1 %v5510_v60 }
  0x3c   :  { %4595 = vmatpush3.bf16.msk.msra.mxu0 %vm5245_vm4, %v6506_v24  ;;  %4627 = vmatpush3.bf16.msk.msra.mxu1 %vm5245_vm4, %v6506_v24 }
  0x3d   :  { %4597 = vmatprep.subr.msk.bf16.mxu0 %vm5259_vm6, %v6506_v24  ;;  %4629 = vmatprep.subr.msk.bf16.mxu1 %vm5259_vm6, %v6506_v24 }
  0x3e   :  { %3922 = vmatprep.mubr.f32.mxu0 %v5520_v61  ;;  %3957 = vmatprep.mubr.f32.mxu1 %v5522_v62 }
  0x40   :  { %4599 = vmatpush3.bf16.msk.msra.mxu0 %vm5259_vm6, %v6506_v24  ;;  %4631 = vmatpush3.bf16.msk.msra.mxu1 %vm5259_vm6, %v6506_v24 }
  0x41   :  { %4601 = vmatprep.subr.msk.bf16.mxu0 %vm5296_vm8, %v6506_v24  ;;  %4633 = vmatprep.subr.msk.bf16.mxu1 %vm5296_vm8, %v6506_v24 }
  0x44   :  { %4603 = vmatpush3.bf16.msk.msra.mxu0 %vm5296_vm8, %v6506_v24  ;;  %4635 = vmatpush3.bf16.msk.msra.mxu1 %vm5296_vm8, %v6506_v24 }
  0x45   :  { %4605 = vmatprep.subr.msk.bf16.mxu0 %vm6550_vm14, %v6506_v24  ;;  %4637 = vmatprep.subr.msk.bf16.mxu1 %vm6550_vm14, %v6506_v24 }
  0x48   :  { %4607 = vmatpush3.bf16.msk.msra.mxu0 %vm6550_vm14, %v6506_v24  ;;  %4639 = vmatpush3.bf16.msk.msra.mxu1 %vm6550_vm14, %v6506_v24 }
  0x49   :  { %4609 = vmatprep.subr.msk.bf16.mxu0 %vm5338_vm2, %v6506_v24  ;;  %4641 = vmatprep.subr.msk.bf16.mxu1 %vm5338_vm2, %v6506_v24 }
  0x4c   :  { %4611 = vmatpush3.bf16.msk.msra.mxu0 %vm5338_vm2, %v6506_v24  ;;  %4643 = vmatpush3.bf16.msk.msra.mxu1 %vm5338_vm2, %v6506_v24 }
  0x4d   :  { %4613 = vmatprep.subr.msk.bf16.mxu0 %vm5354_vm7, %v6506_v24  ;;  %4645 = vmatprep.subr.msk.bf16.mxu1 %vm5354_vm7, %v6506_v24 }
  0x50   :  { %4615 = vmatpush3.bf16.msk.msra.mxu0 %vm5354_vm7, %v6506_v24  ;;  %4647 = vmatpush3.bf16.msk.msra.mxu1 %vm5354_vm7, %v6506_v24 }
  0x51   :  { %4617 = vmatprep.subr.msk.bf16.mxu0 %vm5465_vm0, %v6506_v24  ;;  %4649 = vmatprep.subr.msk.bf16.mxu1 %vm5465_vm0, %v6506_v24 }
  0x54   :  { %4619 = vmatpush3.bf16.msk.msra.mxu0 %vm5465_vm0, %v6506_v24  ;;  %4651 = vmatpush3.bf16.msk.msra.mxu1 %vm5465_vm0, %v6506_v24 }
  0x55   :  { %4621 = vmatprep.subr.msk.bf16.mxu0 %vm5486_vm11, %v6506_v24  ;;  %4653 = vmatprep.subr.msk.bf16.mxu1 %vm5486_vm11, %v6506_v24 }
  0x58   :  { %4623 = vmatpush3.bf16.msk.msra.mxu0 %vm5486_vm11, %v6506_v24  ;;  %4655 = vmatpush3.bf16.msk.msra.mxu1 %vm5486_vm11, %v6506_v24 }
  0x59   :  { %4657 = vmatprep.subr.msk.bf16.mxu0 %vm5614_vm12, %v6506_v24  ;;  %4689 = vmatprep.subr.msk.bf16.mxu1 %vm5614_vm12, %v6506_v24 }
  0x5b   :  { %3923 = vmatmul.mubr.f32.vlgmr.msra.gmra.mrb[2].mxu0 %v5624_v0  ;;  %3958 = vmatmul.mubr.f32.vlgmr.msra.gmra.mrb[2].mxu1 %v5626_v4 }
  0x5c   :  { %4659 = vmatpush3.bf16.msk.msra.mxu0 %vm5614_vm12, %v6506_v24  ;;  %4691 = vmatpush3.bf16.msk.msra.mxu1 %vm5614_vm12, %v6506_v24 }
  0x5d   :  { %4661 = vmatprep.subr.msk.bf16.mxu0 %vm6553_vm1, %v6506_v24  ;;  %4693 = vmatprep.subr.msk.bf16.mxu1 %vm6553_vm1, %v6506_v24 }
  0x5e   :  { %3992 = vmatprep.mubr.f32.mxu0 %v5234_v18  ;;  %4027 = vmatprep.mubr.f32.mxu1 %v5243_v20 }
  0x60   :  { %4663 = vmatpush3.bf16.msk.msra.mxu0 %vm6553_vm1, %v6506_v24  ;;  %4695 = vmatpush3.bf16.msk.msra.mxu1 %vm6553_vm1, %v6506_v24 }
  0x61   :  { %4665 = vmatprep.subr.msk.bf16.mxu0 %vm6554_vm3, %v6506_v24  ;;  %4697 = vmatprep.subr.msk.bf16.mxu1 %vm6554_vm3, %v6506_v24 }
  0x64   :  { %4667 = vmatpush3.bf16.msk.msra.mxu0 %vm6554_vm3, %v6506_v24  ;;  %4699 = vmatpush3.bf16.msk.msra.mxu1 %vm6554_vm3, %v6506_v24 }
  0x65   :  { %4669 = vmatprep.subr.msk.bf16.mxu0 %vm6555_vm5, %v6506_v24  ;;  %4701 = vmatprep.subr.msk.bf16.mxu1 %vm6555_vm5, %v6506_v24 }
  0x68   :  { %4671 = vmatpush3.bf16.msk.msra.mxu0 %vm6555_vm5, %v6506_v24  ;;  %4703 = vmatpush3.bf16.msk.msra.mxu1 %vm6555_vm5, %v6506_v24 }
  0x69   :  { %4673 = vmatprep.subr.msk.bf16.mxu0 %vm6556_vm10, %v6506_v24  ;;  %4705 = vmatprep.subr.msk.bf16.mxu1 %vm6556_vm10, %v6506_v24 }
  0x6c   :  { %4675 = vmatpush3.bf16.msk.msra.mxu0 %vm6556_vm10, %v6506_v24  ;;  %4707 = vmatpush3.bf16.msk.msra.mxu1 %vm6556_vm10, %v6506_v24 }
  0x6d   :  { %4677 = vmatprep.subr.msk.bf16.mxu0 %vm5437_vm13, %v6506_v24  ;;  %4709 = vmatprep.subr.msk.bf16.mxu1 %vm5437_vm13, %v6506_v24 }
  0x70   :  { %4679 = vmatpush3.bf16.msk.msra.mxu0 %vm5437_vm13, %v6506_v24  ;;  %4711 = vmatpush3.bf16.msk.msra.mxu1 %vm5437_vm13, %v6506_v24 }
  0x71   :  { %4681 = vmatprep.subr.msk.bf16.mxu0 %vm5441_vm9, %v6506_v24  ;;  %4713 = vmatprep.subr.msk.bf16.mxu1 %vm5441_vm9, %v6506_v24 }
  0x74   :  { %4683 = vmatpush3.bf16.msk.msra.mxu0 %vm5441_vm9, %v6506_v24  ;;  %4715 = vmatpush3.bf16.msk.msra.mxu1 %vm5441_vm9, %v6506_v24 }
  0x75   :  { %4685 = vmatprep.subr.msk.bf16.mxu0 %vm5448_vm15, %v6506_v24  ;;  %4717 = vmatprep.subr.msk.bf16.mxu1 %vm5448_vm15, %v6506_v24 }
  0x78   :  { %4687 = vmatpush3.bf16.msk.msra.mxu0 %vm5448_vm15, %v6506_v24  ;;  %4719 = vmatpush3.bf16.msk.msra.mxu1 %vm5448_vm15, %v6506_v24 }
  0x79   :  { %4721 = vmatprep.subr.msk.bf16.mxu0 %vm5614_vm12, %v6506_v24  ;;  %4753 = vmatprep.subr.msk.bf16.mxu1 %vm5614_vm12, %v6506_v24 }
  0x7b   :  { %3993 = vmatmul.mubr.f32.vlgmr.msra.gmra.mrb[4].mxu0 %v5508_v59  ;;  %4028 = vmatmul.mubr.f32.vlgmr.msra.gmra.mrb[4].mxu1 %v5510_v60 }
  0x7c   :  { %4723 = vmatpush3.bf16.msk.msra.mxu0 %vm5614_vm12, %v6506_v24  ;;  %4755 = vmatpush3.bf16.msk.msra.mxu1 %vm5614_vm12, %v6506_v24 }
  0x7d   :  { %4725 = vmatprep.subr.msk.bf16.mxu0 %vm6553_vm1, %v6506_v24  ;;  %4757 = vmatprep.subr.msk.bf16.mxu1 %vm6553_vm1, %v6506_v24 }
  0x7e   :  { %4062 = vmatprep.mubr.f32.mxu0 %v5520_v61  ;;  %4097 = vmatprep.mubr.f32.mxu1 %v5522_v62 }
  0x80   :  { %4727 = vmatpush3.bf16.msk.msra.mxu0 %vm6553_vm1, %v6506_v24  ;;  %4759 = vmatpush3.bf16.msk.msra.mxu1 %vm6553_vm1, %v6506_v24 }
  0x81   :  { %4729 = vmatprep.subr.msk.bf16.mxu0 %vm6554_vm3, %v6506_v24  ;;  %4761 = vmatprep.subr.msk.bf16.mxu1 %vm6554_vm3, %v6506_v24 }
  0x84   :  { %4731 = vmatpush3.bf16.msk.msra.mxu0 %vm6554_vm3, %v6506_v24  ;;  %4763 = vmatpush3.bf16.msk.msra.mxu1 %vm6554_vm3, %v6506_v24 }
  0x85   :  { %4733 = vmatprep.subr.msk.bf16.mxu0 %vm6555_vm5, %v6506_v24  ;;  %4765 = vmatprep.subr.msk.bf16.mxu1 %vm6555_vm5, %v6506_v24 }
  0x88   :  { %4735 = vmatpush3.bf16.msk.msra.mxu0 %vm6555_vm5, %v6506_v24  ;;  %4767 = vmatpush3.bf16.msk.msra.mxu1 %vm6555_vm5, %v6506_v24 }
  0x89   :  { %4737 = vmatprep.subr.msk.bf16.mxu0 %vm6556_vm10, %v6506_v24  ;;  %4769 = vmatprep.subr.msk.bf16.mxu1 %vm6556_vm10, %v6506_v24 }
  0x8c   :  { %4739 = vmatpush3.bf16.msk.msra.mxu0 %vm6556_vm10, %v6506_v24  ;;  %4771 = vmatpush3.bf16.msk.msra.mxu1 %vm6556_vm10, %v6506_v24 }
  0x8d   :  { %4741 = vmatprep.subr.msk.bf16.mxu0 %vm5437_vm13, %v6506_v24  ;;  %4773 = vmatprep.subr.msk.bf16.mxu1 %vm5437_vm13, %v6506_v24 }
  0x90   :  { %4743 = vmatpush3.bf16.msk.msra.mxu0 %vm5437_vm13, %v6506_v24  ;;  %4775 = vmatpush3.bf16.msk.msra.mxu1 %vm5437_vm13, %v6506_v24  ;;  %vm1115_vm13 = vcmask 1040384  }
  0x91   :  { %4745 = vmatprep.subr.msk.bf16.mxu0 %vm5441_vm9, %v6506_v24  ;;  %4777 = vmatprep.subr.msk.bf16.mxu1 %vm5441_vm9, %v6506_v24 }
  0x94   :  { %4747 = vmatpush3.bf16.msk.msra.mxu0 %vm5441_vm9, %v6506_v24  ;;  %4779 = vmatpush3.bf16.msk.msra.mxu1 %vm5441_vm9, %v6506_v24  ;;  %vm6510_vm9 = vmmov 0  }
  0x95   :  { %4749 = vmatprep.subr.msk.bf16.mxu0 %vm5448_vm15, %v6506_v24  ;;  %4781 = vmatprep.subr.msk.bf16.mxu1 %vm5448_vm15, %v6506_v24  ;;  %v752_v15 = vpop.permute.xlu0 %751  ;;  %v769_v16 = vpop.permute.xlu1 %768 }
  0x96   :  { %v775_v32 = vmul.f32 %v769_v16, %v5234_v18  ;;  %v777_v36 = vmul.f32 %v769_v16, %v5243_v20 }
  0x98   :  { %4751 = vmatpush3.bf16.msk.msra.mxu0 %vm5448_vm15, %v6506_v24  ;;  %4783 = vmatpush3.bf16.msk.msra.mxu1 %vm5448_vm15, %v6506_v24  ;;  %vm6557_vm15 = vmmov 0  }
  0x99   :  { %4784 = vmatprep.subr.bf16.mxu0 %v5146_v5  ;;  %4787 = vmatprep.subr.bf16.mxu1 %v5146_v5  ;;  %v757_v17 = vpop.permute.xlu0 %756  ;;  %v773_v19 = vpop.permute.xlu1 %772 }
  0x9a   :  { %v776_v23 = vmul.f32 %v773_v19, %v5508_v59  ;;  %v778_v28 = vmul.f32 %v773_v19, %v5510_v60 }
  0x9b   :  { %4063 = vmatmul.mubr.f32.vlgmr.msra.gmra.mrb[6].mxu0 %v5624_v0  ;;  %4098 = vmatmul.mubr.f32.vlgmr.msra.gmra.mrb[6].mxu1 %v5626_v4 }
  0x9c   :  { %4104 = vmatprep.mubr.msk.f32.mxu0 %vm6510_vm9, %v5148_v6  ;;  %4111 = vmatprep.mubr.msk.f32.mxu1 %vm6510_vm9, %v5148_v6  ;;  %vm831_vm9 = vcmask 130048  }
  0xa2   :  { %v5836_v22 = vpop.permute.xlu0 %792  ;;  %v797_v30 = vpop.permute.xlu1 %796 }
 0x10e   :  { %v3854_v7 = vpop.f32.mrb[0].mxu0  ;;  %v3889_v8 = vpop.f32.mrb[0].mxu1 }
 0x10f   :  { %v215_v9 = vpop.f32.mrb[1].mxu0  ;;  %v290_v10 = vpop.f32.mrb[1].mxu1  ;;  %v760_v26 = vmul.f32 %v3854_v7, %v757_v17  ;;  %v762_v27 = vmul.f32 %v3889_v8, %v757_v17 }
 0x110   :  { %v759_v31 = vmul.f32 %v752_v15, %v215_v9  ;;  %v761_v33 = vmul.f32 %v752_v15, %v290_v10  ;;  %v821_v9 = vpop.permute.xlu0 %820  ;;  %v817_v10 = vpop.permute.xlu1 %816 }
 0x111   :  { %v786_v43 = vadd.f32 %v778_v28, %v762_v27  ;;  %v784_v44 = vadd.f32 %v776_v23, %v760_v26 }
 0x112   :  { %v783_v59 = vadd.f32 %v775_v32, %v759_v31  ;;  %v785_v7 = vadd.f32 %v777_v36, %v761_v33  ;;  %v780_v32 = vmul.f32 %v773_v19, %v5624_v0  ;;  %v782_v36 = vmul.f32 %v773_v19, %v5626_v4 }
 0x12e   :  { %v3924_v11 = vpop.f32.mrb[2].mxu0  ;;  %v3959_v12 = vpop.f32.mrb[2].mxu1 }
 0x12f   :  { %v365_v13 = vpop.f32.mrb[3].mxu0  ;;  %v440_v14 = vpop.f32.mrb[3].mxu1  ;;  %v766_v33 = vmul.f32 %v3959_v12, %v757_v17 }
 0x14e   :  { %v3994_v38 = vpop.f32.mrb[4].mxu0  ;;  %v4029_v40 = vpop.f32.mrb[4].mxu1 }
 0x14f   :  { %v800_v47 = vmul.f32 %v3994_v38, %v797_v30  ;;  %v802_v48 = vmul.f32 %v4029_v40, %v797_v30  ;;  %v515_v53 = vpop.f32.mrb[5].mxu0  ;;  %v590_v54 = vpop.f32.mrb[5].mxu1  ;;  %v763_v38 = vmul.f32 %v752_v15, %v365_v13  ;;  %v779_v40 = vmul.f32 %v769_v16, %v5520_v61 }
 0x150   :  { %v799_v8 = vmul.f32 %v5836_v22, %v515_v53  ;;  %v801_v60 = vmul.f32 %v5836_v22, %v590_v54  ;;  %v790_v54 = vadd.f32 %v782_v36, %v766_v33 }
 0x151   :  { %v808_v24 = vadd.f32 %v800_v47, %v784_v44  ;;  %v810_v18 = vadd.f32 %v802_v48, %v786_v43  ;;  %v765_v43 = vmul.f32 %v752_v15, %v440_v14  ;;  %v781_v44 = vmul.f32 %v769_v16, %v5522_v62 }
 0x152   :  { %v807_v56 = vadd.f32 %v799_v8, %v783_v59  ;;  %v809_v20 = vadd.f32 %v801_v60, %v785_v7 }
 0x153   :  { %v5844_v46 = vadd.f32 %v821_v9, %v808_v24  ;;  %v5846_v27 = vadd.f32 %v821_v9, %v810_v18  ;;  %v5149_v24 = vmov 1.0   ;;  %v789_v18 = vadd.f32 %v781_v44, %v765_v43 }
 0x154   :  { %v5848_v23 = vadd.f32 %v817_v10, %v807_v56  ;;  %v5850_v26 = vadd.f32 %v817_v10, %v809_v20  ;;  %v764_v56 = vmul.f32 %v3924_v11, %v757_v17  ;;  %v787_v11 = vadd.f32 %v779_v40, %v763_v38 }
 0x155   :  { %v5150_v43 = vmov 4   ;;  %v5902_v44 = vsub.s32 0, %v5202_v3 }
 0x156   :  { %v4785_v28 = vpack.c.bf16 %v5844_v46, %v5848_v23  ;;  %v4788_v31 = vpack.c.bf16 %v5846_v27, %v5850_v26  ;;  %v788_v53 = vadd.f32 %v780_v32, %v764_v56  ;;  %5023 = vset.pattern.permute.xlu1 %v5150_v43  ;;  %5024 = vset.pattern.permute.xlu0 %v5150_v43 }
 0x158   :  { %4786 = vmatpush3.bf16.msra.mxu0 %v4785_v28  ;;  %4789 = vmatpush3.bf16.msra.mxu1 %v4788_v31 }
 0x159   :  { %4790 = vmatprep.subr.bf16.mxu0 %v5146_v5  ;;  %4793 = vmatprep.subr.bf16.mxu1 %v5146_v5 }
 0x15b   :  { %4105 = vmatmul.mubr.msk.f32.vlgmr.msra.gmra.mrb[8].mxu0 %vm831_vm9, %v5149_v24  ;;  %4112 = vmatmul.mubr.msk.f32.vlgmr.msra.gmra.mrb[8].mxu1 %vm831_vm9, %v5149_v24 }
 0x15c   :  { %4118 = vmatprep.mubr.msk.f32.mxu0 %vm6557_vm15, %v5148_v6  ;;  %4125 = vmatprep.mubr.msk.f32.mxu1 %vm6557_vm15, %v5148_v6 }
 0x16e   :  { %v4064_v47 = vpop.f32.mrb[6].mxu0  ;;  %v4099_v48 = vpop.f32.mrb[6].mxu1 }
 0x16f   :  { %v804_v59 = vmul.f32 %v4064_v47, %v797_v30  ;;  %v806_v7 = vmul.f32 %v4099_v48, %v797_v30  ;;  %v665_v8 = vpop.f32.mrb[7].mxu0  ;;  %v740_v60 = vpop.f32.mrb[7].mxu1 }
 0x170   :  { %v803_v0 = vmul.f32 %v5836_v22, %v665_v8  ;;  %v805_v4 = vmul.f32 %v5836_v22, %v740_v60 }
 0x171   :  { %v812_v12 = vadd.f32 %v804_v59, %v788_v53  ;;  %v814_v13 = vadd.f32 %v806_v7, %v790_v54 }
 0x172   :  { %v811_v61 = vadd.f32 %v803_v0, %v787_v11  ;;  %v813_v14 = vadd.f32 %v805_v4, %v789_v18 }
 0x173   :  { %v5872_v15 = vadd.f32 %v821_v9, %v812_v12  ;;  %v5874_v62 = vadd.f32 %v821_v9, %v814_v13 }
 0x174   :  { %v5876_v16 = vadd.f32 %v817_v10, %v811_v61  ;;  %v5878_v17 = vadd.f32 %v817_v10, %v813_v14 }
 0x176   :  { %v4791_v19 = vpack.c.bf16 %v5872_v15, %v5876_v16  ;;  %v4794_v30 = vpack.c.bf16 %v5874_v62, %v5878_v17 }
 0x178   :  { %4792 = vmatpush3.bf16.msra.mxu0 %v4791_v19  ;;  %4795 = vmatpush3.bf16.msra.mxu1 %v4794_v30 }
 0x179   :  { %4796 = vmatprep.subr.bf16.mxu0 %v5146_v5  ;;  %4799 = vmatprep.subr.bf16.mxu1 %v5146_v5 }
 0x17b   :  { %4119 = vmatmul.mubr.msk.f32.vlgmr.msra.gmra.mrb[10].mxu0 %vm831_vm9, %v5149_v24  ;;  %4126 = vmatmul.mubr.msk.f32.vlgmr.msra.gmra.mrb[10].mxu1 %vm831_vm9, %v5149_v24 }
 0x17c   :  { %4132 = vmatprep.mubr.msk.f32.mxu0 %vm6557_vm15, %v5148_v6  ;;  %4139 = vmatprep.mubr.msk.f32.mxu1 %vm6557_vm15, %v5148_v6 }
 0x22e   :  { %v901_v22 = vpop.f32.mrb[8].mxu0  ;;  %v971_v9 = vpop.f32.mrb[8].mxu1 }
 0x22f   :  { %v1119_v10 = vsel %vm1115_vm13, %v971_v9, 0.0  ;;  %v1116_v20 = vsel %vm1115_vm13, %v901_v22, 0.0  ;;  %v4106_v28 = vpop.f32.mrb[9].mxu0  ;;  %v4113_v31 = vpop.f32.mrb[9].mxu1 }
 0x230   :  { %1120 = vadd.xlane.f32.xlu0 %v1119_v10  ;;  %1117 = vadd.xlane.f32.xlu1 %v1116_v20 }
 0x24e   :  { %v1041_v56 = vpop.f32.mrb[10].mxu0  ;;  %v1111_v32 = vpop.f32.mrb[10].mxu1 }
 0x24f   :  { %v4120_v33 = vpop.f32.mrb[11].mxu0  ;;  %v1125_v36 = vsel %vm1115_vm13, %v1111_v32, 0.0  ;;  %v1122_v38 = vsel %vm1115_vm13, %v1041_v56, 0.0  ;;  %v4127_v40 = vpop.f32.mrb[11].mxu1 }
 0x250   :  { %1126 = vadd.xlane.f32.xlu0 %v1125_v36  ;;  %1123 = vadd.xlane.f32.xlu1 %v1122_v38 }
 0x261   :  { %1493 = vperm.xlu1 %5023, %v5276_v29  }
 0x2bd   :  { %v1121_v47 = vpop.xlane.xlu0 %1120  ;;  %v1118_v48 = vpop.xlane.xlu1 %1117 }
 0x2be   :  { %v1129_v53 = vmul.f32 0.00048828125, %v1121_v47  ;;  %v1128_v54 = vmul.f32 0.00048828125, %v1118_v48 }
 0x2c0   :  { %v1139_v59 = vrot.slane %v1129_v53, %v5902_v44  ;;  %v1135_v7 = vrot.slane %v1128_v54, %v5902_v44 }
 0x2c2   :  { %v5907_v8 = vsub.f32 %v5850_v26, %v1139_v59  ;;  %v5910_v60 = vsub.f32 %v5846_v27, %v1139_v59  ;;  %v5913_v11 = vsub.f32 %v5848_v23, %v1135_v7  ;;  %v5916_v3 = vsub.f32 %v5844_v46, %v1135_v7 }
 0x2c4   :  { %v1158_v18 = vmul.f32 %v5907_v8, %v5907_v8  ;;  %v1159_v0 = vmul.f32 %v5910_v60, %v5910_v60  ;;  %v1156_v4 = vmul.f32 %v5913_v11, %v5913_v11  ;;  %v1157_v26 = vmul.f32 %v5916_v3, %v5916_v3 }
 0x2c6   :  { %v4797_v27 = vpack.c.bf16 %v1157_v26, %v1156_v4  ;;  %v4800_v12 = vpack.c.bf16 %v1159_v0, %v1158_v18  ;;  %v5979_v18 = vld [vmem:[%s6494_s2] sm:$0xff] }
 0x2c8   :  { %4798 = vmatpush3.bf16.msra.mxu0 %v4797_v27  ;;  %4801 = vmatpush3.bf16.msra.mxu1 %v4800_v12 }
 0x2c9   :  { %4802 = vmatprep.subr.bf16.mxu0 %v5146_v5  ;;  %4805 = vmatprep.subr.bf16.mxu1 %v5146_v5 }
 0x2cb   :  { %4133 = vmatmul.mubr.msk.f32.vlgmr.msra.gmra.mrb[12].mxu0 %vm831_vm9, %v5149_v24  ;;  %4140 = vmatmul.mubr.msk.f32.vlgmr.msra.gmra.mrb[12].mxu1 %vm831_vm9, %v5149_v24 }
 0x2cc   :  { %4146 = vmatprep.mubr.msk.f32.mxu0 %vm6557_vm15, %v5148_v6  ;;  %4153 = vmatprep.mubr.msk.f32.mxu1 %vm6557_vm15, %v5148_v6 }
 0x2dd   :  { %v1127_v46 = vpop.xlane.xlu0 %1126  ;;  %v1124_v23 = vpop.xlane.xlu1 %1123 }
 0x2de   :  { %v1131_v13 = vmul.f32 0.00048828125, %v1127_v46  ;;  %v1130_v61 = vmul.f32 0.00048828125, %v1124_v23 }
 0x2e0   :  { %v1147_v14 = vrot.slane %v1131_v13, %v5902_v44  ;;  %v1143_v19 = vrot.slane %v1130_v61, %v5902_v44 }
 0x2e2   :  { %v5939_v30 = vsub.f32 %v5878_v17, %v1147_v14  ;;  %v5942_v22 = vsub.f32 %v5874_v62, %v1147_v14  ;;  %v5945_v9 = vsub.f32 %v5876_v16, %v1143_v19  ;;  %v5948_v10 = vsub.f32 %v5872_v15, %v1143_v19 }
 0x2e3   :  { %v5151_v15 = vmov 5  }
 0x2e4   :  { %v1162_v20 = vmul.f32 %v5939_v30, %v5939_v30  ;;  %v1163_v28 = vmul.f32 %v5942_v22, %v5942_v22  ;;  %v1160_v31 = vmul.f32 %v5945_v9, %v5945_v9  ;;  %v1161_v17 = vmul.f32 %v5948_v10, %v5948_v10  ;;  %5025 = vset.pattern.permute.xlu1 %v5151_v15 }
 0x2e6   :  { %v4803_v62 = vpack.c.bf16 %v1161_v17, %v1160_v31  ;;  %v4806_v56 = vpack.c.bf16 %v1163_v28, %v1162_v20 }
 0x2e8   :  { %4804 = vmatpush3.bf16.msra.mxu0 %v4803_v62  ;;  %4807 = vmatpush3.bf16.msra.mxu1 %v4806_v56 }
 0x2e9   :  { %4156 = vmatprep.subr.bf16.mxu0 %v5148_v6  ;;  %4162 = vmatprep.subr.bf16.mxu1 %v5148_v6 }
 0x2eb   :  { %4147 = vmatmul.mubr.msk.f32.vlgmr.msra.gmra.mrb[14].mxu0 %vm831_vm9, %v5149_v24  ;;  %4154 = vmatmul.mubr.msk.f32.vlgmr.msra.gmra.mrb[14].mxu1 %vm831_vm9, %v5149_v24 }
 0x2ec   :  { %4158 = vmatprep.mubr.msk.bf16.mxu0 %vm6557_vm15, %v5148_v6  ;;  %4164 = vmatprep.mubr.msk.bf16.mxu1 %vm6557_vm15, %v5148_v6 }
 0x39e   :  { %v1230_v16 = vpop.f32.mrb[12].mxu0  ;;  %v1300_v32 = vpop.f32.mrb[12].mxu1 }
 0x39f   :  { %v1447_v33 = vsel %vm1115_vm13, %v1300_v32, 0.0  ;;  %v1444_v36 = vsel %vm1115_vm13, %v1230_v16, 0.0  ;;  %v4134_v38 = vpop.f32.mrb[13].mxu0  ;;  %v4141_v40 = vpop.f32.mrb[13].mxu1 }
 0x3a0   :  { %1448 = vadd.xlane.f32.xlu0 %v1447_v33  ;;  %1445 = vadd.xlane.f32.xlu1 %v1444_v36 }
 0x3be   :  { %v1370_v47 = vpop.f32.mrb[14].mxu0  ;;  %v1440_v48 = vpop.f32.mrb[14].mxu1 }
 0x3bf   :  { %v4148_v53 = vpop.f32.mrb[15].mxu0  ;;  %v1453_v54 = vsel %vm1115_vm13, %v1440_v48, 0.0  ;;  %v1450_v59 = vsel %vm1115_vm13, %v1370_v47, 0.0  ;;  %v4155_v7 = vpop.f32.mrb[15].mxu1 }
 0x3c0   :  { %1454 = vadd.xlane.f32.xlu0 %v1453_v54  ;;  %1451 = vadd.xlane.f32.xlu1 %v1450_v59 }
 0x3d1   :  { %1509 = vperm.xlu1 %5025, %v5276_v29   ;;  %v6558_v29 = vmov 2  }
 0x3d5   :  { %1513 = vperm.xlu1 %5025, %v5307_v35  }
 0x3d6   :  { %1497 = vperm.xlu0 %5024, %v5307_v35   ;;  %v6559_v35 = vmov 3  }
 0x3d9   :  { %5026 = vset.pattern.permute.xlu1 %v5150_v43  ;;  %v1494_v43 = vpop.permute.xlu1 %1493 }
 0x3da   :  { %1530 = vperm.xlu1 %5026, %v5979_v18  }
 0x3de   :  { %5027 = vset.pattern.permute.xlu1 %v5151_v15 }
 0x3df   :  { %1805 = vperm.xlu1 %5027, %v5979_v18  }
 0x3e3   :  { %5028 = vset.pattern.permute.xlu1 %v5142_v2 }
 0x3e4   :  { %2872 = vperm.xlu1 %5028, %v5979_v18  }
 0x3e8   :  { %5029 = vset.pattern.permute.xlu1 %v5141_v1 }
 0x3e9   :  { %2880 = vperm.xlu1 %5029, %v5979_v18  }
 0x3ed   :  { %5030 = vset.pattern.permute.xlu1 %v6558_v29 }
 0x3ee   :  { %2892 = vperm.xlu1 %5030, %v5979_v18  }
 0x3f2   :  { %5031 = vset.pattern.permute.xlu1 %v6559_v35 }
 0x3f3   :  { %2904 = vperm.xlu1 %5031, %v5979_v18  }
 0x42d   :  { %v1449_v0 = vpop.xlane.xlu0 %1448  ;;  %v1446_v4 = vpop.xlane.xlu1 %1445 }
 0x42e   :  { %v1457_v26 = vmul.f32 0.00048828125, %v1449_v0  ;;  %v1456_v27 = vmul.f32 0.00048828125, %v1446_v4 }
 0x430   :  { %v1461_v2 = vadd.f32 1e-08, %v1457_v26  ;;  %v1460_v12 = vadd.f32 1e-08, %v1456_v27 }
 0x432   :  { %5034 = vrsqrt.f32 %v1461_v2 }
 0x433   :  { %5036 = vrsqrt.f32 %v1460_v12 }
 0x43c   :  { %v5035_v1 = vpop.eup %5034 }
 0x43d   :  { %v5037_v46 = vpop.eup %5036  ;;  %v1475_v20 = vrot.slane %v5035_v1, %v5902_v44 }
 0x43e   :  { %v1471_v19 = vrot.slane %v5037_v46, %v5902_v44 }
 0x43f   :  { %v1486_v56 = vmul.f32 %v1475_v20, %v5907_v8  ;;  %v1487_v15 = vmul.f32 %v1475_v20, %v5910_v60  ;;  %v147_v8 = vld [vmem:[%s6495_s3] sm:$0xf] }
 0x440   :  { %v1484_v62 = vmul.f32 %v1471_v19, %v5913_v11  ;;  %v1485_v16 = vmul.f32 %v1471_v19, %v5916_v3 }
 0x441   :  { %v1502_v38 = vmul.f32 %v1494_v43, %v1486_v56 }
 0x442   :  { %v1500_v36 = vmul.f32 %v1494_v43, %v1484_v62 }
 0x44d   :  { %v1455_v23 = vpop.xlane.xlu0 %1454  ;;  %v1452_v13 = vpop.xlane.xlu1 %1451 }
 0x44e   :  { %v1459_v61 = vmul.f32 0.00048828125, %v1455_v23  ;;  %v1458_v14 = vmul.f32 0.00048828125, %v1452_v13 }
 0x450   :  { %v1463_v28 = vadd.f32 1e-08, %v1459_v61  ;;  %v1462_v31 = vadd.f32 1e-08, %v1458_v14 }
 0x451   :  { %v1510_v17 = vpop.permute.xlu1 %1509 }
 0x452   :  { %5038 = vrsqrt.f32 %v1463_v28  ;;  %v1516_v48 = vadd.f32 %v1510_v17, %v1500_v36  ;;  %v1518_v53 = vadd.f32 %v1510_v17, %v1502_v38 }
 0x453   :  { %5040 = vrsqrt.f32 %v1462_v31 }
 0x455   :  { %v1498_v32 = vpop.permute.xlu0 %1497  ;;  %v1514_v33 = vpop.permute.xlu1 %1513 }
 0x456   :  { %v1501_v40 = vmul.f32 %v1498_v32, %v1485_v16  ;;  %v1503_v47 = vmul.f32 %v1498_v32, %v1487_v15 }
 0x458   :  { %v1517_v54 = vadd.f32 %v1514_v33, %v1501_v40  ;;  %v1519_v59 = vadd.f32 %v1514_v33, %v1503_v47 }
 0x45a   :  { %v1524_v7 = vpack.c.bf16 %v1517_v54, %v1516_v48  ;;  %v1525_v29 = vpack.c.bf16 %v1519_v59, %v1518_v53 }
 0x45c   :  { %v5039_v11 = vpop.eup %5038  ;;  %4157 = vmatpush3.bf16.msra.mxu0 %v1524_v7  ;;  %4163 = vmatpush3.bf16.msra.mxu1 %v1525_v29 }
 0x45d   :  { %v5041_v60 = vpop.eup %5040  ;;  %v1483_v3 = vrot.slane %v5039_v11, %v5902_v44  ;;  %4168 = vmatprep.subr.bf16.mxu0 %v5148_v6  ;;  %4174 = vmatprep.subr.bf16.mxu1 %v5148_v6 }
 0x45e   :  { %v1479_v35 = vrot.slane %v5041_v60, %v5902_v44 }
 0x45f   :  { %v1490_v0 = vmul.f32 %v1483_v3, %v5939_v30  ;;  %v1491_v4 = vmul.f32 %v1483_v3, %v5942_v22  ;;  %4159 = vmatmul.mubr.msk.bf16.vlgmr.msra.gmra.mrb[16].mxu0 %vm831_vm9, %v147_v8  ;;  %4165 = vmatmul.mubr.msk.bf16.vlgmr.msra.gmra.mrb[16].mxu1 %vm831_vm9, %v147_v8 }
 0x460   :  { %v1488_v26 = vmul.f32 %v1479_v35, %v5945_v9  ;;  %v1489_v27 = vmul.f32 %v1479_v35, %v5948_v10  ;;  %4170 = vmatprep.mubr.msk.bf16.mxu0 %vm6557_vm15, %v5148_v6  ;;  %4176 = vmatprep.mubr.msk.bf16.mxu1 %vm6557_vm15, %v5148_v6  ;;  %v1531_v9 = vpop.permute.xlu1 %1530 }
 0x461   :  { %v1506_v2 = vmul.f32 %v1494_v43, %v1490_v0  ;;  %v1507_v12 = vmul.f32 %v1498_v32, %v1491_v4 }
 0x462   :  { %v1504_v1 = vmul.f32 %v1494_v43, %v1488_v26  ;;  %v1505_v30 = vmul.f32 %v1498_v32, %v1489_v27 }
 0x463   :  { %v1522_v46 = vadd.f32 %v1510_v17, %v1506_v2  ;;  %v1523_v22 = vadd.f32 %v1514_v33, %v1507_v12 }
 0x464   :  { %v1520_v23 = vadd.f32 %v1510_v17, %v1504_v1  ;;  %v1521_v13 = vadd.f32 %v1514_v33, %v1505_v30 }
 0x465   :  { %v1527_v61 = vpack.c.bf16 %v1523_v22, %v1522_v46 }
 0x466   :  { %v1526_v14 = vpack.c.bf16 %v1521_v13, %v1520_v23 }
 0x467   :  { %4175 = vmatpush3.bf16.msra.mxu1 %v1527_v61 }
 0x468   :  { %4169 = vmatpush3.bf16.msra.mxu0 %v1526_v14  ;;  %4186 = vmatprep.subr.bf16.mxu1 %v5148_v6 }
 0x469   :  { %4180 = vmatprep.subr.bf16.mxu0 %v5148_v6 }
 0x46a   :  { %4177 = vmatmul.mubr.msk.bf16.vlgmr.msra.gmra.mrb[20].mxu1 %vm831_vm9, %v147_v8 }
 0x46b   :  { %4171 = vmatmul.mubr.msk.bf16.vlgmr.msra.gmra.mrb[20].mxu0 %vm831_vm9, %v147_v8  ;;  %4188 = vmatprep.mubr.msk.bf16.mxu1 %vm6557_vm15, %v5148_v6 }
 0x46c   :  { %4182 = vmatprep.mubr.msk.bf16.mxu0 %vm6557_vm15, %v5148_v6 }
 0x532   :  { %v1610_v10 = vpop.f32.mrb[16].mxu1  ;;  %v1570_v43 = vpop.f32.mrb[16].mxu0 }
 0x533   :  { %v6022_v19 = vadd.f32 %v1610_v10, %v1531_v9  ;;  %v6024_v20 = vadd.f32 %v1570_v43, %v1531_v9  ;;  %v4160_v28 = vpop.f32.mrb[17].mxu0  ;;  %v4166_v31 = vpop.f32.mrb[17].mxu1 }
 0x534   :  { %v1573_v17 = vpop.f32.mrb[18].mxu0  ;;  %v1613_v62 = vpop.f32.mrb[18].mxu1 }
 0x535   :  { %v6027_v56 = vmul.f32 0.70710677, %v6022_v19  ;;  %v6030_v15 = vmul.f32 0.70710677, %v6024_v20  ;;  %v4161_v16 = vpop.f32.mrb[19].mxu0  ;;  %v4167_v32 = vpop.f32.mrb[19].mxu1 }
 0x537   :  { %v1705_v33 = vand.u32 2147483647, %v6027_v56  ;;  %v1704_v36 = vand.u32 2147483647, %v6030_v15  ;;  %vm1781_vm9 = vcmp.lt.f32.partialorder %v6027_v56, 0.0  ;;  %vm1780_vm13 = vcmp.lt.f32.partialorder %v6030_v15, 0.0 }
 0x539   :  { %v1709_v38 = vmul.f32 0.3275911, %v1705_v33  ;;  %v1708_v40 = vmul.f32 0.3275911, %v1704_v36  ;;  %v1757_v27 = vmul.f32 %v1705_v33, %v1705_v33  ;;  %v1756_v12 = vmul.f32 %v1704_v36, %v1704_v36 }
 0x53b   :  { %v1713_v47 = vadd.f32 1.0, %v1709_v38  ;;  %v1712_v48 = vadd.f32 1.0, %v1708_v40  ;;  %v1761_v23 = vsub.f32 0.0, %v1757_v27 }
 0x53d   :  { %5042 = vrcp.f32 %v1713_v47  ;;  %v1690_v53 = vpop.f32.mrb[20].mxu1  ;;  %v1766_v28 = vmul.f32 1.442695, %v1761_v23 }
 0x53e   :  { %5044 = vrcp.f32 %v1712_v48  ;;  %v1650_v54 = vpop.f32.mrb[20].mxu0  ;;  %v6034_v59 = vadd.f32 %v1690_v53, %v1531_v9  ;;  %v4178_v7 = vpop.f32.mrb[21].mxu1 }
 0x53f   :  { %v6036_v29 = vadd.f32 %v1650_v54, %v1531_v9  ;;  %v4172_v11 = vpop.f32.mrb[21].mxu0  ;;  %v1693_v8 = vpop.f32.mrb[22].mxu1  ;;  %v1760_v9 = vsub.f32 0.0, %v1756_v12 }
 0x540   :  { %v6039_v60 = vmul.f32 0.70710677, %v6034_v59  ;;  %v1653_v3 = vpop.f32.mrb[22].mxu0  ;;  %v4179_v35 = vpop.f32.mrb[23].mxu1 }
 0x541   :  { %v6042_v0 = vmul.f32 0.70710677, %v6036_v29  ;;  %v4173_v4 = vpop.f32.mrb[23].mxu0  ;;  %v1764_v62 = vmul.f32 1.442695, %v1760_v9 }
 0x542   :  { %v1707_v26 = vand.u32 2147483647, %v6039_v60  ;;  %vm1783_vm10 = vcmp.lt.f32.partialorder %v6039_v60, 0.0  ;;  %v1698_v60 = vmul.f32 0.5, %v6036_v29  ;;  %v6099_v29 = vpop.permute.xlu1 %1805 }
 0x543   :  { %v1706_v2 = vand.u32 2147483647, %v6042_v0  ;;  %vm1782_vm5 = vcmp.lt.f32.partialorder %v6042_v0, 0.0 }
 0x544   :  { %v1711_v1 = vmul.f32 0.3275911, %v1707_v26  ;;  %v1759_v33 = vmul.f32 %v1707_v26, %v1707_v26 }
 0x545   :  { %v1710_v30 = vmul.f32 0.3275911, %v1706_v2  ;;  %v1758_v38 = vmul.f32 %v1706_v2, %v1706_v2 }
 0x546   :  { %v1715_v46 = vadd.f32 1.0, %v1711_v1  ;;  %v1763_v54 = vsub.f32 0.0, %v1759_v33 }
 0x547   :  { %v5043_v22 = vpop.eup %5042  ;;  %v1714_v13 = vadd.f32 1.0, %v1710_v30  ;;  %v1762_v8 = vsub.f32 0.0, %v1758_v38 }
 0x548   :  { %v5045_v61 = vpop.eup %5044  ;;  %v1721_v14 = vmul.f32 1.0614054, %v5043_v22  ;;  %5046 = vrcp.f32 %v1715_v46  ;;  %v1770_v26 = vmul.f32 1.442695, %v1763_v54 }
 0x549   :  { %v1720_v10 = vmul.f32 1.0614054, %v5045_v61  ;;  %5048 = vrcp.f32 %v1714_v13  ;;  %v1768_v23 = vmul.f32 1.442695, %v1762_v8 }
 0x54a   :  { %v1725_v43 = vadd.f32 -1.4531521, %v1721_v14  ;;  %5050 = vpow2.f32 %v1766_v28 }
 0x54b   :  { %v1724_v31 = vadd.f32 -1.4531521, %v1720_v10  ;;  %5052 = vpow2.f32 %v1764_v62 }
 0x54c   :  { %v1729_v17 = vmul.f32 %v5043_v22, %v1725_v43  ;;  %5054 = vpow2.f32 %v1770_v26 }
 0x54d   :  { %v1728_v16 = vmul.f32 %v5045_v61, %v1724_v31  ;;  %5056 = vpow2.f32 %v1768_v23 }
 0x54e   :  { %v1733_v32 = vadd.f32 1.4214138, %v1729_v17 }
 0x54f   :  { %v1732_v36 = vadd.f32 1.4214138, %v1728_v16 }
 0x550   :  { %v1737_v40 = vmul.f32 %v5043_v22, %v1733_v32 }
 0x551   :  { %v1736_v47 = vmul.f32 %v5045_v61, %v1732_v36 }
 0x552   :  { %v5047_v48 = vpop.eup %5046  ;;  %v1741_v53 = vadd.f32 -0.28449672, %v1737_v40 }
 0x553   :  { %v5049_v7 = vpop.eup %5048  ;;  %v1740_v11 = vadd.f32 -0.28449672, %v1736_v47  ;;  %v1723_v3 = vmul.f32 1.0614054, %v5047_v48 }
 0x554   :  { %v1745_v35 = vmul.f32 %v5043_v22, %v1741_v53  ;;  %v1722_v4 = vmul.f32 1.0614054, %v5049_v7  ;;  %v5051_v9 = vpop.eup %5050 }
 0x555   :  { %v1744_v27 = vmul.f32 %v5045_v61, %v1740_v11  ;;  %v1727_v12 = vadd.f32 -1.4531521, %v1723_v3  ;;  %v5053_v28 = vpop.eup %5052  ;;  %v1697_v11 = vmul.f32 0.5, %v6022_v19 }
 0x556   :  { %v1749_v1 = vadd.f32 0.2548296, %v1745_v35  ;;  %v1726_v30 = vadd.f32 -1.4531521, %v1722_v4  ;;  %v1696_v4 = vmul.f32 0.5, %v6024_v20  ;;  %v5055_v26 = vpop.eup %5054 }
 0x557   :  { %v1748_v46 = vadd.f32 0.2548296, %v1744_v27  ;;  %v1731_v2 = vmul.f32 %v5047_v48, %v1727_v12  ;;  %v5057_v23 = vpop.eup %5056 }
 0x558   :  { %v1753_v13 = vmul.f32 %v5043_v22, %v1749_v1  ;;  %v1730_v14 = vmul.f32 %v5049_v7, %v1726_v30 }
 0x559   :  { %v1752_v10 = vmul.f32 %v5045_v61, %v1748_v46  ;;  %v1735_v43 = vadd.f32 1.4214138, %v1731_v2 }
 0x55a   :  { %v1773_v31 = vmul.f32 %v5051_v9, %v1753_v13  ;;  %v1734_v17 = vadd.f32 1.4214138, %v1730_v14 }
 0x55b   :  { %v1772_v62 = vmul.f32 %v5053_v28, %v1752_v10  ;;  %v1739_v16 = vmul.f32 %v5047_v48, %v1735_v43 }
 0x55c   :  { %v1777_v32 = vsub.f32 1.0, %v1773_v31  ;;  %v1738_v33 = vmul.f32 %v5049_v7, %v1734_v17  ;;  %v1699_v17 = vmul.f32 0.5, %v6034_v59 }
 0x55d   :  { %v1776_v36 = vsub.f32 1.0, %v1772_v62  ;;  %v1743_v38 = vadd.f32 -0.28449672, %v1739_v16 }
 0x55e   :  { %v1785_v40 = vsub.f32 0.0, %v1777_v32  ;;  %v1742_v47 = vadd.f32 -0.28449672, %v1738_v33 }
 0x55f   :  { %v1784_v22 = vsub.f32 0.0, %v1776_v36  ;;  %v1747_v53 = vmul.f32 %v5047_v48, %v1743_v38 }
 0x560   :  { %v1789_v54 = vsel %vm1781_vm9, %v1785_v40, %v1777_v32  ;;  %v1746_v61 = vmul.f32 %v5049_v7, %v1742_v47  ;;  %vm1812_vm9 = vcmask 1043456  }
 0x561   :  { %v1793_v8 = vadd.f32 1.0, %v1789_v54  ;;  %v1788_v3 = vsel %vm1780_vm13, %v1784_v22, %v1776_v36  ;;  %v1751_v35 = vadd.f32 0.2548296, %v1747_v53  ;;  %vm1808_vm13 = vcmask 64512  }
 0x562   :  { %v1792_v27 = vadd.f32 1.0, %v1788_v3  ;;  %v1750_v12 = vadd.f32 0.2548296, %v1746_v61 }
 0x563   :  { %v6050_v1 = vmul.f32 %v1793_v8, %v1697_v11  ;;  %v1755_v30 = vmul.f32 %v5047_v48, %v1751_v35 }
 0x564   :  { %v6052_v56 = vmul.f32 %v1792_v27, %v1696_v4  ;;  %v1754_v46 = vmul.f32 %v5049_v7, %v1750_v12  ;;  %v6063_v7 = vld [vmem:[%s6496_s4] sm:$0xf]  ;;  %s5154_s4 = smov [#allocation5]  }
 0x565   :  { %v1775_v15 = vmul.f32 %v5055_v26, %v1755_v30  ;;  %v1801_v19 = vpack.c.bf16 %v6050_v1, %v6050_v1  ;;  %s3192_s13 = sshll.u32 %s5154_s4, 4  ;;  %s3193_s13 = int_to_ptr.vmem [resolvable:$true] %s3192_s13 }
 0x566   :  { %v1774_v2 = vmul.f32 %v5057_v23, %v1754_v46  ;;  %v1800_v13 = vpack.c.bf16 %v6052_v56, %v6052_v56  ;;  %s5112_s14 = scalar_lea.vmem %s3193_s13, 512  ;;  %p5117_p9 = scmp.lt.s32.totalorder %s3193_s13, %s3193_s13 }
 0x567   :  { %v1779_v20 = vsub.f32 1.0, %v1775_v15  ;;  %v1857_v14 = vsel %vm1812_vm9, %v1801_v19, 0  ;;  %p5113_p8 = scmp.ne.s32.totalorder %s3193_s13, %s5112_s14  ;;  %p5118_p10 = scmp.lt.s32.totalorder %s5112_s14, %s5112_s14 }
 0x568   :  { %v1778_v9 = vsub.f32 1.0, %v1774_v2  ;;  %v1814_v48 = vsel %vm1812_vm9, %v1800_v13, 0  ;;  %4187 = vmatpush3.bf16.msra.mxu1 %v1857_v14 }
 0x569   :  { %v1787_v10 = vsub.f32 0.0, %v1779_v20  ;;  %4181 = vmatpush3.bf16.msra.mxu0 %v1814_v48  ;;  %4198 = vmatprep.subr.bf16.mxu1 %v5148_v6  ;;  %v6560_v48 = vmov 1.0|1.0   ;;  %p5119_p11 = por %p5118_p10, %p5117_p9 }
 0x56a   :  { %v1786_v43 = vsub.f32 0.0, %v1778_v9  ;;  %4192 = vmatprep.subr.bf16.mxu0 %v5148_v6 }
 0x56b   :  { %v1791_v28 = vsel %vm1783_vm10, %v1787_v10, %v1779_v20  ;;  %4189 = vmatmul.mubr.msk.bf16.vlgmr.msra.gmra.mrb[24].mxu1 %vm1808_vm13, %v6063_v7  ;;  %v2873_v10 = vpop.permute.xlu1 %2872  ;;  %p5120_p12 = pnand %p5119_p11, %p5113_p8 }
 0x56c   :  { %v1790_v31 = vsel %vm1782_vm5, %v1786_v43, %v1778_v9  ;;  %v1795_v62 = vadd.f32 1.0, %v1791_v28  ;;  %4183 = vmatmul.mubr.msk.bf16.vlgmr.msra.gmra.mrb[24].mxu0 %vm1808_vm13, %v6063_v7  ;;  %4200 = vmatprep.mubr.msk.bf16.mxu1 %vm6557_vm15, %v5148_v6 }
 0x56d   :  { %v1794_v16 = vadd.f32 1.0, %v1790_v31  ;;  %4194 = vmatprep.mubr.msk.bf16.mxu0 %vm6557_vm15, %v5148_v6 }
 0x56e   :  { %v6079_v0 = vmul.f32 %v1795_v62, %v1699_v17 }
 0x56f   :  { %v6081_v32 = vmul.f32 %v1794_v16, %v1698_v60  ;;  %v2881_v43 = vpop.permute.xlu1 %2880 }
 0x570   :  { %v1803_v59 = vpack.c.bf16 %v6079_v0, %v6079_v0  ;;  %v2883_v62 = vmul.f32 %v2881_v43, %v6052_v56  ;;  %v2884_v60 = vmul.f32 %v2881_v43, %v6050_v1 }
 0x571   :  { %v1802_v33 = vpack.c.bf16 %v6081_v32, %v6081_v32 }
 0x572   :  { %v1943_v36 = vsel %vm1812_vm9, %v1803_v59, 0 }
 0x573   :  { %v1900_v38 = vsel %vm1812_vm9, %v1802_v33, 0  ;;  %4199 = vmatpush3.bf16.msra.mxu1 %v1943_v36  ;;  %v2893_v28 = vpop.permute.xlu1 %2892 }
 0x574   :  { %4193 = vmatpush3.bf16.msra.mxu0 %v1900_v38  ;;  %4209 = vmatprep.subr.mxu1 %v5148_v6 }
 0x575   :  { %4204 = vmatprep.subr.mxu0 %v5148_v6 }
 0x576   :  { %4201 = vmatmul.mubr.msk.bf16.vlgmr.msra.gmra.mrb[28].mxu1 %vm1808_vm13, %v6063_v7 }
 0x577   :  { %4195 = vmatmul.mubr.msk.bf16.vlgmr.msra.gmra.mrb[28].mxu0 %vm1808_vm13, %v6063_v7  ;;  %4211 = vmatprep.mubr.msk.f32.mxu1 %vm6557_vm15, %v5148_v6 }
 0x578   :  { %4206 = vmatprep.mubr.msk.f32.mxu0 %vm6557_vm15, %v5148_v6 }
 0x63e   :  { %v1893_v40 = vpop.f32.mrb[24].mxu1 }
 0x63f   :  { %v1850_v47 = vpop.f32.mrb[24].mxu0  ;;  %v1894_v22 = vadd.f32 %v1893_v40, %v6099_v29  ;;  %v4190_v53 = vpop.f32.mrb[25].mxu1 }
 0x640   :  { %v1851_v54 = vadd.f32 %v1850_v47, %v6099_v29  ;;  %v4184_v61 = vpop.f32.mrb[25].mxu0  ;;  %v1896_v11 = vpop.f32.mrb[26].mxu1 }
 0x641   :  { %v1986_v8 = vmul.f32 %v1894_v22, %v1894_v22  ;;  %v1853_v3 = vpop.f32.mrb[26].mxu0  ;;  %v4191_v35 = vpop.f32.mrb[27].mxu1 }
 0x642   :  { %v1985_v4 = vmul.f32 %v1851_v54, %v1851_v54  ;;  %v4185_v27 = vpop.f32.mrb[27].mxu0  ;;  %v2905_v53 = vpop.permute.xlu1 %2904 }
 0x643   :  { %4210 = vmatpush3.msra.mxu1 %v1986_v8 }
 0x644   :  { %4205 = vmatpush3.msra.mxu0 %v1985_v4  ;;  %4212 = vmatmul.mubr.msk.f32.vlgmr.msra.gmra.mrb[32].mxu1 %vm1808_vm13, %v5149_v24 }
 0x645   :  { %4207 = vmatmul.mubr.msk.f32.vlgmr.msra.gmra.mrb[32].mxu0 %vm1808_vm13, %v5149_v24  ;;  %4214 = vmatprep.subr.mxu0 %v5148_v6 }
 0x646   :  { %4219 = vmatprep.subr.mxu1 %v5148_v6  ;;  %4216 = vmatprep.mubr.msk.f32.mxu0 %vm6557_vm15, %v5148_v6 }
 0x647   :  { %4221 = vmatprep.mubr.msk.f32.mxu1 %vm6557_vm15, %v5148_v6 }
 0x649   :  { %v1979_v12 = vpop.f32.mrb[28].mxu1 }
 0x64a   :  { %v1936_v30 = vpop.f32.mrb[28].mxu0  ;;  %v1980_v26 = vadd.f32 %v1979_v12, %v6099_v29  ;;  %v4202_v46 = vpop.f32.mrb[29].mxu1  ;;  %v2885_v12 = vmul.f32 %v2881_v43, %v6081_v32 }
 0x64b   :  { %v1937_v23 = vadd.f32 %v1936_v30, %v6099_v29  ;;  %v4196_v15 = vpop.f32.mrb[29].mxu0  ;;  %v1982_v19 = vpop.f32.mrb[30].mxu1  ;;  %v2886_v30 = vmul.f32 %v2881_v43, %v6079_v0 }
 0x64c   :  { %v1988_v2 = vmul.f32 %v1980_v26, %v1980_v26  ;;  %v1939_v13 = vpop.f32.mrb[30].mxu0  ;;  %v4203_v20 = vpop.f32.mrb[31].mxu1 }
 0x64d   :  { %v1987_v14 = vmul.f32 %v1937_v23, %v1937_v23  ;;  %v4197_v9 = vpop.f32.mrb[31].mxu0 }
 0x64e   :  { %4220 = vmatpush3.msra.mxu1 %v1988_v2 }
 0x64f   :  { %4215 = vmatpush3.msra.mxu0 %v1987_v14  ;;  %4222 = vmatmul.mubr.msk.f32.vlgmr.msra.gmra.mrb[34].mxu1 %vm1808_vm13, %v5149_v24 }
 0x650   :  { %4217 = vmatmul.mubr.msk.f32.vlgmr.msra.gmra.mrb[34].mxu0 %vm1808_vm13, %v5149_v24  ;;  %4808 = vmatprep.subr.bf16.mxu0 %v5146_v5 }
 0x651   :  { %4832 = vmatprep.subr.bf16.mxu1 %v5146_v5  ;;  %4810 = vmatpush3.bf16.msk.msra.mxu0 %vm5245_vm4, %v6560_v48 }
 0x652   :  { %4834 = vmatpush3.bf16.msk.msra.mxu1 %vm5245_vm4, %v6560_v48  ;;  %4811 = vmatprep.subr.bf16.mxu0 %v5146_v5 }
 0x653   :  { %4835 = vmatprep.subr.bf16.mxu1 %v5146_v5  ;;  %4256 = vmatprep.mubr.msk.f32.mxu0 %vm6557_vm15, %v5148_v6 }
 0x654   :  { %4291 = vmatprep.mubr.msk.f32.mxu1 %vm6557_vm15, %v5148_v6 }
 0x655   :  { %4813 = vmatpush3.bf16.msk.msra.mxu0 %vm5259_vm6, %v6560_v48 }
 0x656   :  { %4837 = vmatpush3.bf16.msk.msra.mxu1 %vm5259_vm6, %v6560_v48  ;;  %4814 = vmatprep.subr.bf16.mxu0 %v5146_v5 }
 0x657   :  { %4838 = vmatprep.subr.bf16.mxu1 %v5146_v5 }
 0x659   :  { %4816 = vmatpush3.bf16.msk.msra.mxu0 %vm5296_vm8, %v6560_v48 }
 0x65a   :  { %4840 = vmatpush3.bf16.msk.msra.mxu1 %vm5296_vm8, %v6560_v48  ;;  %4817 = vmatprep.subr.bf16.mxu0 %v5146_v5 }
 0x65b   :  { %4841 = vmatprep.subr.bf16.mxu1 %v5146_v5 }
 0x65d   :  { %4819 = vmatpush3.bf16.msk.msra.mxu0 %vm6550_vm14, %v6560_v48 }
 0x65e   :  { %4843 = vmatpush3.bf16.msk.msra.mxu1 %vm6550_vm14, %v6560_v48  ;;  %4820 = vmatprep.subr.bf16.mxu0 %v5146_v5 }
 0x65f   :  { %4844 = vmatprep.subr.bf16.mxu1 %v5146_v5 }
 0x661   :  { %4822 = vmatpush3.bf16.msk.msra.mxu0 %vm5338_vm2, %v6560_v48 }
 0x662   :  { %4846 = vmatpush3.bf16.msk.msra.mxu1 %vm5338_vm2, %v6560_v48  ;;  %4823 = vmatprep.subr.bf16.mxu0 %v5146_v5 }
 0x663   :  { %4847 = vmatprep.subr.bf16.mxu1 %v5146_v5 }
 0x665   :  { %4825 = vmatpush3.bf16.msk.msra.mxu0 %vm5354_vm7, %v6560_v48 }
 0x666   :  { %4849 = vmatpush3.bf16.msk.msra.mxu1 %vm5354_vm7, %v6560_v48  ;;  %4826 = vmatprep.subr.bf16.mxu0 %v5146_v5 }
 0x667   :  { %4850 = vmatprep.subr.bf16.mxu1 %v5146_v5 }
 0x669   :  { %4828 = vmatpush3.bf16.msk.msra.mxu0 %vm5465_vm0, %v6560_v48 }
 0x66a   :  { %4852 = vmatpush3.bf16.msk.msra.mxu1 %vm5465_vm0, %v6560_v48  ;;  %4829 = vmatprep.subr.bf16.mxu0 %v5146_v5 }
 0x66b   :  { %4853 = vmatprep.subr.bf16.mxu1 %v5146_v5 }
 0x66d   :  { %4831 = vmatpush3.bf16.msk.msra.mxu0 %vm5486_vm11, %v6560_v48 }
 0x66e   :  { %4855 = vmatpush3.bf16.msk.msra.mxu1 %vm5486_vm11, %v6560_v48  ;;  %4856 = vmatprep.subr.bf16.mxu0 %v5146_v5 }
 0x66f   :  { %4880 = vmatprep.subr.bf16.mxu1 %v5146_v5 }
 0x670   :  { %4257 = vmatmul.mubr.f32.vlgmr.msra.gmra.mrb[36].mxu0 %v6052_v56 }
 0x671   :  { %4292 = vmatmul.mubr.f32.vlgmr.msra.gmra.mrb[36].mxu1 %v6050_v1  ;;  %4858 = vmatpush3.bf16.msk.msra.mxu0 %vm5245_vm4, %v6560_v48 }
 0x672   :  { %4882 = vmatpush3.bf16.msk.msra.mxu1 %vm5245_vm4, %v6560_v48  ;;  %4859 = vmatprep.subr.bf16.mxu0 %v5146_v5  ;;  %vm6561_vm4 = vnez %v6535_v49  ;;  %v5152_v49 = vmov 6  }
 0x673   :  { %4883 = vmatprep.subr.bf16.mxu1 %v5146_v5  ;;  %4326 = vmatprep.mubr.msk.f32.mxu0 %vm6557_vm15, %v5148_v6 }
 0x674   :  { %4361 = vmatprep.mubr.msk.f32.mxu1 %vm6557_vm15, %v5148_v6  ;;  %5032 = vset.pattern.permute.xlu1 %v5152_v49 }
 0x675   :  { %4861 = vmatpush3.bf16.msk.msra.mxu0 %vm5259_vm6, %v6560_v48 }
 0x676   :  { %4885 = vmatpush3.bf16.msk.msra.mxu1 %vm5259_vm6, %v6560_v48  ;;  %4862 = vmatprep.subr.bf16.mxu0 %v5146_v5  ;;  %vm6562_vm6 = vnez %v6537_v50  ;;  %v5153_v50 = vmov 7  }
 0x677   :  { %4886 = vmatprep.subr.bf16.mxu1 %v5146_v5  ;;  %5033 = vset.pattern.permute.xlu0 %v5153_v50 }
 0x679   :  { %4864 = vmatpush3.bf16.msk.msra.mxu0 %vm5296_vm8, %v6560_v48 }
 0x67a   :  { %4888 = vmatpush3.bf16.msk.msra.mxu1 %vm5296_vm8, %v6560_v48  ;;  %4865 = vmatprep.subr.bf16.mxu0 %v5146_v5  ;;  %vm6563_vm8 = vnez %v6541_v51 }
 0x67b   :  { %4889 = vmatprep.subr.bf16.mxu1 %v5146_v5 }
 0x67d   :  { %4867 = vmatpush3.bf16.msk.msra.mxu0 %vm6550_vm14, %v6560_v48 }
 0x67e   :  { %4891 = vmatpush3.bf16.msk.msra.mxu1 %vm6550_vm14, %v6560_v48  ;;  %4868 = vmatprep.subr.bf16.mxu0 %v5146_v5 }
 0x67f   :  { %4892 = vmatprep.subr.bf16.mxu1 %v5146_v5 }
 0x681   :  { %4870 = vmatpush3.bf16.msk.msra.mxu0 %vm5338_vm2, %v6560_v48 }
 0x682   :  { %4894 = vmatpush3.bf16.msk.msra.mxu1 %vm5338_vm2, %v6560_v48  ;;  %4871 = vmatprep.subr.bf16.mxu0 %v5146_v5  ;;  %vm6564_vm2 = vnez %v6543_v52 }
 0x683   :  { %4895 = vmatprep.subr.bf16.mxu1 %v5146_v5 }
 0x685   :  { %4873 = vmatpush3.bf16.msk.msra.mxu0 %vm5354_vm7, %v6560_v48 }
 0x686   :  { %4897 = vmatpush3.bf16.msk.msra.mxu1 %vm5354_vm7, %v6560_v48  ;;  %4874 = vmatprep.subr.bf16.mxu0 %v5146_v5  ;;  %vm6565_vm7 = vnez %v6545_v55 }
 0x687   :  { %4898 = vmatprep.subr.bf16.mxu1 %v5146_v5 }
 0x689   :  { %4876 = vmatpush3.bf16.msk.msra.mxu0 %vm5465_vm0, %v6560_v48 }
 0x68a   :  { %4900 = vmatpush3.bf16.msk.msra.mxu1 %vm5465_vm0, %v6560_v48  ;;  %4877 = vmatprep.subr.bf16.mxu0 %v5146_v5 }
 0x68b   :  { %4901 = vmatprep.subr.bf16.mxu1 %v5146_v5 }
 0x68d   :  { %4879 = vmatpush3.bf16.msk.msra.mxu0 %vm5486_vm11, %v6560_v48 }
 0x68e   :  { %4903 = vmatpush3.bf16.msk.msra.mxu1 %vm5486_vm11, %v6560_v48  ;;  %4904 = vmatprep.subr.bf16.mxu0 %v5146_v5 }
 0x68f   :  { %4928 = vmatprep.subr.bf16.mxu1 %v5146_v5 }
 0x690   :  { %4327 = vmatmul.mubr.f32.vlgmr.msra.gmra.mrb[38].mxu0 %v6081_v32 }
 0x691   :  { %4362 = vmatmul.mubr.f32.vlgmr.msra.gmra.mrb[38].mxu1 %v6079_v0  ;;  %4906 = vmatpush3.bf16.msk.msra.mxu0 %vm5614_vm12, %v6560_v48 }
 0x692   :  { %4930 = vmatpush3.bf16.msk.msra.mxu1 %vm5614_vm12, %v6560_v48  ;;  %4907 = vmatprep.subr.bf16.mxu0 %v5146_v5 }
 0x693   :  { %4931 = vmatprep.subr.bf16.mxu1 %v5146_v5  ;;  %4396 = vmatprep.mubr.msk.f32.mxu0 %vm6557_vm15, %v5148_v6 }
 0x694   :  { %4431 = vmatprep.mubr.msk.f32.mxu1 %vm6557_vm15, %v5148_v6 }
 0x695   :  { %4909 = vmatpush3.bf16.msk.msra.mxu0 %vm6553_vm1, %v6560_v48 }
 0x696   :  { %4933 = vmatpush3.bf16.msk.msra.mxu1 %vm6553_vm1, %v6560_v48  ;;  %4910 = vmatprep.subr.bf16.mxu0 %v5146_v5 }
 0x697   :  { %4934 = vmatprep.subr.bf16.mxu1 %v5146_v5 }
 0x699   :  { %4912 = vmatpush3.bf16.msk.msra.mxu0 %vm6554_vm3, %v6560_v48 }
 0x69a   :  { %4936 = vmatpush3.bf16.msk.msra.mxu1 %vm6554_vm3, %v6560_v48  ;;  %4913 = vmatprep.subr.bf16.mxu0 %v5146_v5 }
 0x69b   :  { %4937 = vmatprep.subr.bf16.mxu1 %v5146_v5 }
 0x69d   :  { %4915 = vmatpush3.bf16.msk.msra.mxu0 %vm6561_vm4, %v6560_v48 }
 0x69e   :  { %4939 = vmatpush3.bf16.msk.msra.mxu1 %vm6561_vm4, %v6560_v48  ;;  %4916 = vmatprep.subr.bf16.mxu0 %v5146_v5 }
 0x69f   :  { %4940 = vmatprep.subr.bf16.mxu1 %v5146_v5 }
 0x6a1   :  { %4918 = vmatpush3.bf16.msk.msra.mxu0 %vm6562_vm6, %v6560_v48 }
 0x6a2   :  { %4942 = vmatpush3.bf16.msk.msra.mxu1 %vm6562_vm6, %v6560_v48  ;;  %4919 = vmatprep.subr.bf16.mxu0 %v5146_v5 }
 0x6a3   :  { %4943 = vmatprep.subr.bf16.mxu1 %v5146_v5 }
 0x6a5   :  { %4921 = vmatpush3.bf16.msk.msra.mxu0 %vm6563_vm8, %v6560_v48 }
 0x6a6   :  { %4945 = vmatpush3.bf16.msk.msra.mxu1 %vm6563_vm8, %v6560_v48  ;;  %4922 = vmatprep.subr.bf16.mxu0 %v5146_v5 }
 0x6a7   :  { %4946 = vmatprep.subr.bf16.mxu1 %v5146_v5 }
 0x6a9   :  { %4924 = vmatpush3.bf16.msk.msra.mxu0 %vm6564_vm2, %v6560_v48 }
 0x6aa   :  { %4948 = vmatpush3.bf16.msk.msra.mxu1 %vm6564_vm2, %v6560_v48  ;;  %4925 = vmatprep.subr.bf16.mxu0 %v5146_v5 }
 0x6ab   :  { %4949 = vmatprep.subr.bf16.mxu1 %v5146_v5 }
 0x6ad   :  { %4927 = vmatpush3.bf16.msk.msra.mxu0 %vm6565_vm7, %v6560_v48 }
 0x6ae   :  { %4951 = vmatpush3.bf16.msk.msra.mxu1 %vm6565_vm7, %v6560_v48  ;;  %4952 = vmatprep.subr.bf16.mxu0 %v5146_v5 }
 0x6af   :  { %4976 = vmatprep.subr.bf16.mxu1 %v5146_v5 }
 0x6b0   :  { %4397 = vmatmul.mubr.f32.vlgmr.msra.gmra.mrb[40].mxu0 %v6052_v56 }
 0x6b1   :  { %4432 = vmatmul.mubr.f32.vlgmr.msra.gmra.mrb[40].mxu1 %v6050_v1  ;;  %4954 = vmatpush3.bf16.msk.msra.mxu0 %vm5614_vm12, %v6560_v48 }
 0x6b2   :  { %4978 = vmatpush3.bf16.msk.msra.mxu1 %vm5614_vm12, %v6560_v48  ;;  %4955 = vmatprep.subr.bf16.mxu0 %v5146_v5 }
 0x6b3   :  { %4979 = vmatprep.subr.bf16.mxu1 %v5146_v5  ;;  %4466 = vmatprep.mubr.msk.f32.mxu0 %vm6557_vm15, %v5148_v6 }
 0x6b4   :  { %4501 = vmatprep.mubr.msk.f32.mxu1 %vm6557_vm15, %v5148_v6 }
 0x6b5   :  { %4957 = vmatpush3.bf16.msk.msra.mxu0 %vm6553_vm1, %v6560_v48 }
 0x6b6   :  { %4981 = vmatpush3.bf16.msk.msra.mxu1 %vm6553_vm1, %v6560_v48  ;;  %4958 = vmatprep.subr.bf16.mxu0 %v5146_v5 }
 0x6b7   :  { %4982 = vmatprep.subr.bf16.mxu1 %v5146_v5 }
 0x6b9   :  { %4960 = vmatpush3.bf16.msk.msra.mxu0 %vm6554_vm3, %v6560_v48 }
 0x6ba   :  { %4984 = vmatpush3.bf16.msk.msra.mxu1 %vm6554_vm3, %v6560_v48  ;;  %4961 = vmatprep.subr.bf16.mxu0 %v5146_v5 }
 0x6bb   :  { %4985 = vmatprep.subr.bf16.mxu1 %v5146_v5 }
 0x6bd   :  { %4963 = vmatpush3.bf16.msk.msra.mxu0 %vm6561_vm4, %v6560_v48 }
 0x6be   :  { %4987 = vmatpush3.bf16.msk.msra.mxu1 %vm6561_vm4, %v6560_v48  ;;  %4964 = vmatprep.subr.bf16.mxu0 %v5146_v5 }
 0x6bf   :  { %4988 = vmatprep.subr.bf16.mxu1 %v5146_v5 }
 0x6c1   :  { %4966 = vmatpush3.bf16.msk.msra.mxu0 %vm6562_vm6, %v6560_v48 }
 0x6c2   :  { %4990 = vmatpush3.bf16.msk.msra.mxu1 %vm6562_vm6, %v6560_v48  ;;  %4967 = vmatprep.subr.bf16.mxu0 %v5146_v5 }
 0x6c3   :  { %4991 = vmatprep.subr.bf16.mxu1 %v5146_v5 }
 0x6c5   :  { %4969 = vmatpush3.bf16.msk.msra.mxu0 %vm6563_vm8, %v6560_v48 }
 0x6c6   :  { %4993 = vmatpush3.bf16.msk.msra.mxu1 %vm6563_vm8, %v6560_v48  ;;  %4970 = vmatprep.subr.bf16.mxu0 %v5146_v5 }
 0x6c7   :  { %4994 = vmatprep.subr.bf16.mxu1 %v5146_v5 }
 0x6c9   :  { %4972 = vmatpush3.bf16.msk.msra.mxu0 %vm6564_vm2, %v6560_v48 }
 0x6ca   :  { %4996 = vmatpush3.bf16.msk.msra.mxu1 %vm6564_vm2, %v6560_v48  ;;  %4973 = vmatprep.subr.bf16.mxu0 %v5146_v5 }
 0x6cb   :  { %4997 = vmatprep.subr.bf16.mxu1 %v5146_v5 }
 0x6cd   :  { %4975 = vmatpush3.bf16.msk.msra.mxu0 %vm6565_vm7, %v6560_v48 }
 0x6ce   :  { %4999 = vmatpush3.bf16.msk.msra.mxu1 %vm6565_vm7, %v6560_v48  ;;  %4504 = vmatprep.subr.bf16.mxu0 %v5148_v6 }
 0x6cf   :  { %4510 = vmatprep.subr.bf16.mxu1 %v5148_v6 }
 0x6d0   :  { %4467 = vmatmul.mubr.f32.vlgmr.msra.gmra.mrb[42].mxu0 %v6081_v32 }
 0x6d1   :  { %4502 = vmatmul.mubr.f32.vlgmr.msra.gmra.mrb[42].mxu1 %v6079_v0  ;;  %4506 = vmatprep.mubr.msk.bf16.mxu0 %vm6557_vm15, %v5148_v6 }
 0x6d2   :  { %4512 = vmatprep.mubr.msk.bf16.mxu1 %vm6557_vm15, %v5148_v6 }
 0x717   :  { %v6405_v21 = vpop.f32.mrb[32].mxu1 }
 0x718   :  { %v6407_v25 = vpop.f32.mrb[32].mxu0  ;;  %v4213_v34 = vpop.f32.mrb[33].mxu1  ;;  %5058 = vrsqrt.f32 %v6405_v21  ;;  %vm2280_vm0 = vcmp.eq.f32.partialorder %v6405_v21, inf  ;;  %vm2282_vm14 = vcmp.eq.f32.partialorder %v6405_v21, 0.0 }
 0x719   :  { %v4208_v37 = vpop.f32.mrb[33].mxu0  ;;  %5060 = vrsqrt.f32 %v6407_v25  ;;  %vm2273_vm11 = vcmp.eq.f32.partialorder %v6407_v25, inf  ;;  %vm2275_vm12 = vcmp.eq.f32.partialorder %v6407_v25, 0.0 }
 0x722   :  { %v6409_v39 = vpop.f32.mrb[34].mxu1 }
 0x723   :  { %v6411_v41 = vpop.f32.mrb[34].mxu0  ;;  %v4223_v42 = vpop.f32.mrb[35].mxu1  ;;  %vm2294_vm8 = vcmp.eq.f32.partialorder %v6409_v39, inf  ;;  %vm2296_vm2 = vcmp.eq.f32.partialorder %v6409_v39, 0.0 }
 0x724   :  { %v4218_v45 = vpop.f32.mrb[35].mxu0  ;;  %vm2287_vm4 = vcmp.eq.f32.partialorder %v6411_v41, inf  ;;  %vm2289_vm6 = vcmp.eq.f32.partialorder %v6411_v41, 0.0 }
 0x725   :  { %v5059_v45 = vpop.eup %5058 }
 0x726   :  { %v5061_v49 = vpop.eup %5060 }
 0x743   :  { %v2377_v51 = vpop.f32.mrb[36].mxu0 }
 0x744   :  { %v2447_v52 = vpop.f32.mrb[36].mxu1  ;;  %v4258_v55 = vpop.f32.mrb[37].mxu0  ;;  %v2875_v31 = vmul.f32 %v2873_v10, %v2377_v51  ;;  %v2279_v51 = vmul.f32 %v5059_v45, %v6405_v21 }
 0x745   :  { %v4293_v57 = vpop.f32.mrb[37].mxu1  ;;  %v2876_v17 = vmul.f32 %v2873_v10, %v2447_v52  ;;  %v2272_v55 = vmul.f32 %v5061_v49, %v6407_v25 }
 0x746   :  { %v2887_v59 = vadd.f32 %v2883_v62, %v2875_v31  ;;  %v2283_v57 = vand.u32 2147483648, %v6405_v21 }
 0x747   :  { %v2888_v40 = vadd.f32 %v2884_v60, %v2876_v17 }
 0x763   :  { %v2517_v58 = vpop.f32.mrb[38].mxu0 }
 0x764   :  { %v2587_v63 = vpop.f32.mrb[38].mxu1  ;;  %v4328_v5 = vpop.f32.mrb[39].mxu0  ;;  %v2877_v4 = vmul.f32 %v2873_v10, %v2517_v58  ;;  %v2274_v58 = vsel %vm2273_vm11, %v6407_v25, %v2272_v55 }
 0x765   :  { %v4363_v24 = vpop.f32.mrb[39].mxu1  ;;  %v2878_v27 = vmul.f32 %v2873_v10, %v2587_v63  ;;  %v2276_v63 = vand.u32 2147483648, %v6407_v25 }
 0x766   :  { %v2889_v46 = vadd.f32 %v2885_v12, %v2877_v4  ;;  %v2290_v4 = vand.u32 2147483648, %v6411_v41 }
 0x767   :  { %v2890_v2 = vadd.f32 %v2886_v30, %v2878_v27  ;;  %v2277_v24 = vsel %vm2275_vm12, %v2276_v63, %v2274_v58 }
 0x768   :  { %v2299_v17 = vadd.f32 1e-06, %v2277_v24 }
 0x783   :  { %v2657_v16 = vpop.f32.mrb[40].mxu0 }
 0x784   :  { %v2727_v33 = vpop.f32.mrb[40].mxu1  ;;  %v2895_v36 = vmul.f32 %v2893_v28, %v2657_v16  ;;  %v4398_v38 = vpop.f32.mrb[41].mxu0 }
 0x785   :  { %v2896_v47 = vmul.f32 %v2893_v28, %v2727_v33  ;;  %v4433_v22 = vpop.f32.mrb[41].mxu1 }
 0x786   :  { %v2899_v54 = vadd.f32 %v2895_v36, %v2887_v59 }
 0x787   :  { %v2900_v61 = vadd.f32 %v2896_v47, %v2888_v40 }
 0x788   :  { %v2907_v11 = vadd.f32 %v2905_v53, %v2899_v54 }
 0x789   :  { %v2908_v8 = vadd.f32 %v2905_v53, %v2900_v61 }
 0x78a   :  { %v2911_v3 = vmul.f32 %v2907_v11, %v2907_v11 }
 0x78b   :  { %v2912_v35 = vmul.f32 %v2908_v8, %v2908_v8 }
 0x78c   :  { %2915 = vadd.xlane.f32.xlu0 %v2911_v3 }
 0x78d   :  { %2917 = vadd.xlane.f32.xlu1 %v2912_v35 }
 0x79e   :  { %2988 = vperm.xlu1 %5032, %v5979_v18  }
 0x7a3   :  { %v2797_v26 = vpop.f32.mrb[42].mxu0 }
 0x7a4   :  { %v2897_v23 = vmul.f32 %v2893_v28, %v2797_v26  ;;  %v2867_v15 = vpop.f32.mrb[42].mxu1  ;;  %v4468_v19 = vpop.f32.mrb[43].mxu0 }
 0x7a5   :  { %v2898_v13 = vmul.f32 %v2893_v28, %v2867_v15  ;;  %v4503_v20 = vpop.f32.mrb[43].mxu1  ;;  %v2297_v15 = vand.u32 2147483648, %v6409_v39 }
 0x7a6   :  { %v2901_v14 = vadd.f32 %v2897_v23, %v2889_v46 }
 0x7a7   :  { %v2902_v9 = vadd.f32 %v2898_v13, %v2890_v2 }
 0x7a8   :  { %v2909_v48 = vadd.f32 %v2905_v53, %v2901_v14 }
 0x7a9   :  { %v2910_v37 = vadd.f32 %v2905_v53, %v2902_v9 }
 0x7aa   :  { %v2913_v34 = vmul.f32 %v2909_v48, %v2909_v48 }
 0x7ab   :  { %v2914_v42 = vmul.f32 %v2910_v37, %v2910_v37 }
 0x7ac   :  { %2919 = vadd.xlane.f32.xlu0 %v2913_v34 }
 0x7b0   :  { %2921 = vadd.xlane.f32.xlu0 %v2914_v42 }
 0x7c6   :  { %2996 = vperm.xlu0 %5033, %v5979_v18   ;;  %v2281_v18 = vsel %vm2280_vm0, %v6405_v21, %v2279_v51 }
 0x7c7   :  { %v2284_v5 = vsel %vm2282_vm14, %v2283_v57, %v2281_v18 }
 0x7c8   :  { %v2300_v43 = vadd.f32 1e-06, %v2284_v5 }
 0x819   :  { %v2916_v50 = vpop.xlane.xlu0 %2915 }
 0x81a   :  { %v2918_v52 = vpop.xlane.xlu1 %2917  ;;  %5062 = vrsqrt.f32 %v2916_v50  ;;  %vm2925_vm1 = vcmp.eq.f32.partialorder %v2916_v50, inf  ;;  %v2928_v60 = vand.u32 2147483648, %v2916_v50  ;;  %vm2927_vm5 = vcmp.eq.f32.partialorder %v2916_v50, 0.0 }
 0x81b   :  { %5064 = vrsqrt.f32 %v2918_v52  ;;  %vm2932_vm3 = vcmp.eq.f32.partialorder %v2918_v52, inf  ;;  %v2935_v21 = vand.u32 2147483648, %v2918_v52  ;;  %vm2934_vm10 = vcmp.eq.f32.partialorder %v2918_v52, 0.0 }
 0x81c   :  { %5066 = vrsqrt.f32 %v6411_v41 }
 0x81d   :  { %5068 = vrcp.f32 %v2300_v43 }
 0x81e   :  { %5070 = vrcp.f32 %v2299_v17  ;;  %v2989_v42 = vpop.permute.xlu1 %2988 }
 0x81f   :  { %5072 = vrsqrt.f32 %v6409_v39 }
 0x824   :  { %v5063_v10 = vpop.eup %5062 }
 0x825   :  { %v5065_v28 = vpop.eup %5064  ;;  %v2924_v31 = vmul.f32 %v5063_v10, %v2916_v50 }
 0x826   :  { %v2931_v62 = vmul.f32 %v5065_v28, %v2918_v52  ;;  %v5067_v40 = vpop.eup %5066 }
 0x827   :  { %v2926_v16 = vsel %vm2925_vm1, %v2916_v50, %v2924_v31  ;;  %v5069_v47 = vpop.eup %5068  ;;  %v2286_v53 = vmul.f32 %v5067_v40, %v6411_v41 }
 0x828   :  { %v2933_v59 = vsel %vm2932_vm3, %v2918_v52, %v2931_v62  ;;  %v2929_v25 = vsel %vm2927_vm5, %v2928_v60, %v2926_v16  ;;  %v5071_v22 = vpop.eup %5070  ;;  %v2308_v61 = vmul.f32 %v5069_v47, %v2284_v5 }
 0x829   :  { %v2936_v33 = vsel %vm2934_vm10, %v2935_v21, %v2933_v59  ;;  %v2951_v36 = vadd.f32 1e-06, %v2929_v25  ;;  %v5073_v54 = vpop.eup %5072  ;;  %v2307_v11 = vmul.f32 %v5071_v22, %v2277_v24  ;;  %v2288_v8 = vsel %vm2287_vm4, %v6411_v41, %v2286_v53 }
 0x82a   :  { %v2952_v38 = vadd.f32 1e-06, %v2936_v33  ;;  %v2293_v3 = vmul.f32 %v5073_v54, %v6409_v39  ;;  %v2291_v30 = vsel %vm2289_vm6, %v2290_v4, %v2288_v8  ;;  %v2970_v26 = vrot.slane %v2308_v61, %v5902_v44 }
 0x82b   :  { %5074 = vrcp.f32 %v2951_v36  ;;  %v2966_v46 = vrot.slane %v2307_v11, %v5902_v44  ;;  %v2301_v13 = vadd.f32 1e-06, %v2291_v30 }
 0x82c   :  { %5076 = vrcp.f32 %v2952_v38  ;;  %v2295_v23 = vsel %vm2294_vm8, %v6409_v39, %v2293_v3  ;;  %v2980_v14 = vmul.f32 %v2970_v26, %v6050_v1 }
 0x82d   :  { %v2298_v41 = vsel %vm2296_vm2, %v2297_v15, %v2295_v23  ;;  %v2979_v9 = vmul.f32 %v2966_v46, %v6052_v56 }
 0x82e   :  { %v2302_v37 = vadd.f32 1e-06, %v2298_v41 }
 0x835   :  { %v5075_v35 = vpop.eup %5074 }
 0x836   :  { %v5077_v27 = vpop.eup %5076  ;;  %v2959_v2 = vmul.f32 %v5075_v35, %v2929_v25 }
 0x837   :  { %v2960_v19 = vmul.f32 %v5077_v27, %v2936_v33 }
 0x838   :  { %v2983_v34 = vmul.f32 %v2979_v9, %v2959_v2 }
 0x839   :  { %v2920_v12 = vpop.xlane.xlu0 %2919  ;;  %v2984_v48 = vmul.f32 %v2980_v14, %v2960_v19 }
 0x83a   :  { %5078 = vrsqrt.f32 %v2920_v12  ;;  %v2991_v49 = vmul.f32 %v2989_v42, %v2983_v34  ;;  %vm2939_vm7 = vcmp.eq.f32.partialorder %v2920_v12, inf  ;;  %v2942_v39 = vand.u32 2147483648, %v2920_v12 }
 0x83b   :  { %v2992_v50 = vmul.f32 %v2989_v42, %v2984_v48  ;;  %vm2941_vm0 = vcmp.eq.f32.partialorder %v2920_v12, 0.0 }
 0x83d   :  { %v2922_v20 = vpop.xlane.xlu0 %2921 }
 0x83e   :  { %5080 = vrsqrt.f32 %v2922_v20  ;;  %vm2946_vm11 = vcmp.eq.f32.partialorder %v2922_v20, inf  ;;  %v2949_v28 = vand.u32 2147483648, %v2922_v20  ;;  %vm2948_vm14 = vcmp.eq.f32.partialorder %v2922_v20, 0.0 }
 0x83f   :  { %5082 = vrcp.f32 %v2301_v13 }
 0x840   :  { %5084 = vrcp.f32 %v2302_v37 }
 0x844   :  { %v5079_v45 = vpop.eup %5078 }
 0x845   :  { %v2938_v51 = vmul.f32 %v5079_v45, %v2920_v12  ;;  %v2997_v52 = vpop.permute.xlu0 %2996 }
 0x846   :  { %v2999_v55 = vadd.f32 %v2997_v52, %v2991_v49  ;;  %v3000_v57 = vadd.f32 %v2997_v52, %v2992_v50 }
 0x847   :  { %v2940_v18 = vsel %vm2939_vm7, %v2920_v12, %v2938_v51 }
 0x848   :  { %v5081_v58 = vpop.eup %5080  ;;  %v2943_v63 = vsel %vm2941_vm0, %v2942_v39, %v2940_v18  ;;  %v3003_v5 = vadd.f32 %v2999_v55, %v6052_v56  ;;  %v3004_v24 = vadd.f32 %v3000_v57, %v6050_v1 }
 0x849   :  { %v2945_v10 = vmul.f32 %v5081_v58, %v2922_v20  ;;  %v2953_v43 = vadd.f32 1e-06, %v2943_v63  ;;  %v5083_v62 = vpop.eup %5082 }
 0x84a   :  { %v3007_v31 = vpack.c.bf16 %v3003_v5, %v3003_v5  ;;  %v3008_v17 = vpack.c.bf16 %v3004_v24, %v3004_v24  ;;  %v2309_v56 = vmul.f32 %v5083_v62, %v2291_v30  ;;  %v5085_v1 = vpop.eup %5084 }
 0x84b   :  { %v2947_v60 = vsel %vm2946_vm11, %v2922_v20, %v2945_v10  ;;  %5086 = vrcp.f32 %v2953_v43  ;;  %v2310_v33 = vmul.f32 %v5085_v1, %v2298_v41 }
 0x84c   :  { %v2950_v21 = vsel %vm2948_vm14, %v2949_v28, %v2947_v60  ;;  %v3012_v16 = vsel %vm1812_vm9, %v3007_v31, 0  ;;  %v3055_v59 = vsel %vm1812_vm9, %v3008_v17, 0  ;;  %v2974_v36 = vrot.slane %v2309_v56, %v5902_v44 }
 0x84d   :  { %v2954_v25 = vadd.f32 1e-06, %v2950_v21  ;;  %4505 = vmatpush3.bf16.msra.mxu0 %v3012_v16  ;;  %4511 = vmatpush3.bf16.msra.mxu1 %v3055_v59  ;;  %v2978_v47 = vrot.slane %v2310_v33, %v5902_v44 }
 0x84e   :  { %4516 = vmatprep.subr.bf16.mxu0 %v5148_v6  ;;  %4522 = vmatprep.subr.bf16.mxu1 %v5148_v6  ;;  %v2981_v22 = vmul.f32 %v2974_v36, %v6081_v32 }
 0x84f   :  { %5088 = vrcp.f32 %v2954_v25  ;;  %v2982_v11 = vmul.f32 %v2978_v47, %v6079_v0 }
 0x850   :  { %4507 = vmatmul.mubr.msk.bf16.vlgmr.msra.gmra.mrb[44].mxu0 %vm1808_vm13, %v6063_v7  ;;  %4513 = vmatmul.mubr.msk.bf16.vlgmr.msra.gmra.mrb[44].mxu1 %vm1808_vm13, %v6063_v7 }
 0x851   :  { %4518 = vmatprep.mubr.msk.bf16.mxu0 %vm6557_vm15, %v5148_v6  ;;  %4524 = vmatprep.mubr.msk.bf16.mxu1 %vm6557_vm15, %v5148_v6 }
 0x855   :  { %v5087_v38 = vpop.eup %5086 }
 0x856   :  { %v2961_v40 = vmul.f32 %v5087_v38, %v2943_v63 }
 0x858   :  { %v2985_v53 = vmul.f32 %v2981_v22, %v2961_v40 }
 0x859   :  { %v5089_v54 = vpop.eup %5088 }
 0x85a   :  { %v2962_v61 = vmul.f32 %v5089_v54, %v2950_v21  ;;  %v2993_v8 = vmul.f32 %v2989_v42, %v2985_v53 }
 0x85c   :  { %v2986_v3 = vmul.f32 %v2982_v11, %v2962_v61  ;;  %v3001_v35 = vadd.f32 %v2997_v52, %v2993_v8 }
 0x85e   :  { %v2994_v4 = vmul.f32 %v2989_v42, %v2986_v3  ;;  %v3005_v6 = vadd.f32 %v3001_v35, %v6081_v32 }
 0x860   :  { %v3002_v27 = vadd.f32 %v2997_v52, %v2994_v4  ;;  %v3009_v12 = vpack.c.bf16 %v3005_v6, %v3005_v6 }
 0x862   :  { %v3006_v30 = vadd.f32 %v3002_v27, %v6079_v0  ;;  %v3098_v26 = vsel %vm1812_vm9, %v3009_v12, 0 }
 0x863   :  { %4517 = vmatpush3.bf16.msra.mxu0 %v3098_v26 }
 0x864   :  { %v3010_v44 = vpack.c.bf16 %v3006_v30, %v3006_v30 }
 0x866   :  { %4519 = vmatmul.mubr.msk.bf16.vlgmr.msra.gmra.mrb[48].mxu0 %vm1808_vm13, %v6063_v7  ;;  %v3141_v46 = vsel %vm1812_vm9, %v3010_v44, 0 }
 0x867   :  { %4523 = vmatpush3.bf16.msra.mxu1 %v3141_v46 }
 0x86a   :  { %4525 = vmatmul.mubr.msk.bf16.vlgmr.msra.gmra.mrb[48].mxu1 %vm1808_vm13, %v6063_v7 }
 0x923   :  { %v3048_v23 = vpop.f32.mrb[44].mxu0  ;;  %v3091_v15 = vpop.f32.mrb[44].mxu1 }
 0x924   :  { %v3049_v32 = vadd.f32 %v3048_v23, %v6099_v29  ;;  %v3092_v19 = vadd.f32 %v3091_v15, %v6099_v29  ;;  %v4508_v0 = vpop.f32.mrb[45].mxu0  ;;  %v4514_v2 = vpop.f32.mrb[45].mxu1 }
 0x925   :  { %v3051_v13 = vpop.f32.mrb[46].mxu0  ;;  %v3094_v20 = vpop.f32.mrb[46].mxu1 }
 0x926   :  { %3183 = vst [vmem:[#allocation5] sm:$0xff] %v3049_v32  ;;  %3184 = vst [vmem:[#allocation5 + $0x8] sm:$0xff] %v3092_v19  ;;  %v4509_v41 = vpop.f32.mrb[47].mxu0  ;;  %v4515_v14 = vpop.f32.mrb[47].mxu1 }
 0x939   :  { %v3134_v9 = vpop.f32.mrb[48].mxu0 }
 0x93a   :  { %v3135_v48 = vadd.f32 %v3134_v9, %v6099_v29  ;;  %v4520_v34 = vpop.f32.mrb[49].mxu0 }
 0x93b   :  { %v3137_v37 = vpop.f32.mrb[50].mxu0 }
 0x93c   :  { %3185 = vst [vmem:[#allocation5 + $0x10] sm:$0xff] %v3135_v48  ;;  %v4521_v7 = vpop.f32.mrb[51].mxu0 }
 0x93d   :  { %v3177_v42 = vpop.f32.mrb[48].mxu1 }
 0x93e   :  { %v3178_v45 = vadd.f32 %v3177_v42, %v6099_v29  ;;  %v4526_v49 = vpop.f32.mrb[49].mxu1 }
 0x93f   :  { %v3180_v50 = vpop.f32.mrb[50].mxu1 }
 0x940   :  { %3186 = vst [vmem:[#allocation5 + $0x18] sm:$0xff] %v3178_v45  ;;  %v4527_v51 = vpop.f32.mrb[51].mxu1 }
 0x941   :  { %5123 = shalt.err (!%p5120_p12)
}
 0x942   :  { %s5124_s17 = scalar_lea.hbm %s6497_s5, 512 }
 0x943   :  { %p5125_p13 = scmp.ne.s32.totalorder %s6497_s5, %s5124_s17  ;;  %p5128_p0 = scmp.lt.u32.totalorder %s5124_s17, %s6497_s5 }
 0x945   :  { %p5130_p1 = pnand %p5128_p0, %p5125_p13 }
 0x947   :  { %5133 = shalt.err (!%p5130_p1)
}
 0x948   :  { %3198 = dma.vmem_to_hbm [thread:$0]  %s3193_s13, 512, %s6497_s5, [#allocation4], %s5139_s28, %s5139_s28, %s5140_s29  }
 0x949   :  { %5136 = dma.done.wait [#allocation4], 512  }
 0x94a   :  { %5137 = vsyncadd [#allocation4], 4294966784 }
 0x94b   :  { %3202 = vsyncpa [#allocation3], 1 }
 0x94c   :  { %3203 = vsyncpa [#allocation4], 1 }

</bundles_post_ra>
